<compile_context>
chip_gen: v6e
topology: v6e:2x2x1
jax: 0.10.0
libtpu: 0.0.40
codegen_flags: <defaults>
</compile_context>

<pallas_src>
import functools

import jax
import jax.numpy as jnp
from jax.experimental import pallas as pl
from jax.experimental.pallas import tpu as pltpu


def _round_up(x: int, m: int) -> int:
    return (x + m - 1) // m * m


def _unembed_kernel(x_ref, w_ref, b_ref, o_ref):
    """One (i, j) grid step: full-K matmul on the MXU + fused bias add."""
    acc = jnp.dot(x_ref[...], w_ref[...], preferred_element_type=jnp.float32)
    o_ref[...] = (acc + b_ref[...]).astype(o_ref.dtype)


@functools.partial(jax.jit, static_argnames=("tm", "tn", "compute_dtype"))
def unembed(x, W_U, b_U, *, tm=None, tn=None, compute_dtype=jnp.bfloat16):
    """x: [batch, posn, d_model]; W_U: [d_model, d_vocab]; b_U: [d_vocab]."""
    batch, posn, d_model = x.shape
    d_vocab = W_U.shape[1]
    out_dtype = x.dtype

    M, K, N = batch * posn, d_model, d_vocab

    # Tile sizes: pad M to at least one MXU-height tile; keep tn a large
    # multiple of 128 so output stores are lane-dense.
    if tm is None:
        tm = min(256, _round_up(M, 128))
    if tn is None:
        tn = min(1024, _round_up(N, 128))

    M_pad = _round_up(M, tm)
    N_pad = _round_up(N, tn)

    # bf16 inputs for the MXU; f32 accumulation + f32 bias inside the kernel.
    x2d = x.reshape(M, K).astype(compute_dtype)
    w = W_U.astype(compute_dtype)
    b2d = b_U.reshape(1, N).astype(jnp.float32)

    if M_pad != M:
        x2d = jnp.pad(x2d, ((0, M_pad - M), (0, 0)))
    if N_pad != N:
        w = jnp.pad(w, ((0, 0), (0, N_pad - N)))
        b2d = jnp.pad(b2d, ((0, 0), (0, N_pad - N)))

    grid = (M_pad // tm, N_pad // tn)

    in_bytes = jnp.dtype(compute_dtype).itemsize
    out_bytes = jnp.dtype(out_dtype).itemsize
    cost = pl.CostEstimate(
        flops=2 * M_pad * K * N_pad,
        transcendentals=0,
        bytes_accessed=(M_pad * K + K * N_pad) * in_bytes
        + M_pad * N_pad * out_bytes
        + N_pad * 4,
    )

    out2d = pl.pallas_call(
        _unembed_kernel,
        out_shape=jax.ShapeDtypeStruct((M_pad, N_pad), out_dtype),
        grid_spec=pltpu.PrefetchScalarGridSpec(
            num_scalar_prefetch=0,
            grid=grid,
            in_specs=[
                pl.BlockSpec((tm, K), lambda i, j: (i, 0)),   # x strip (full K)
                pl.BlockSpec((K, tn), lambda i, j: (0, j)),   # W_U slab (full K)
                pl.BlockSpec((1, tn), lambda i, j: (0, j)),   # bias slab
            ],
            out_specs=pl.BlockSpec((tm, tn), lambda i, j: (i, j)),
        ),
        compiler_params=pltpu.CompilerParams(
            dimension_semantics=("parallel", "parallel"),
            vmem_limit_bytes=32 * 1024 * 1024,
        ),
        cost_estimate=cost,
    )(x2d, w, b2d)

    return out2d[:M, :N].reshape(batch, posn, d_vocab)


if __name__ == "__main__":
    # Small config consistent with the module's shape conventions.
    # d_vocab is deliberately NOT a multiple of the tile width to exercise the
    # padding path (real d_vocab = 50257 isn't either).
    batch, posn = 2, 8
    d_model, d_vocab = 128, 2000
    init_range = 0.02

    key = jax.random.PRNGKey(0)
    kx, kw = jax.random.split(key)

    # Mirrors nn.init.normal_(W_U, std=init_range) and b_U = zeros.
    W_U = jax.random.normal(kw, (d_model, d_vocab), dtype=jnp.float32) * init_range
    b_U = jnp.zeros((d_vocab,), dtype=jnp.float32)

    normalized_resid_final = jax.random.normal(
        kx, (batch, posn, d_model), dtype=jnp.float32
    )

    logits = unembed(normalized_resid_final, W_U, b_U)
    jax.block_until_ready(logits)

    # Reference: same bf16-rounded inputs, f32 accumulation.
    x_bf = normalized_resid_final.astype(jnp.bfloat16).astype(jnp.float32)
    w_bf = W_U.astype(jnp.bfloat16).astype(jnp.float32)
    ref = (
        jnp.einsum("bpd,dv->bpv", x_bf, w_bf, precision=jax.lax.Precision.HIGHEST)
        + b_U
    )

    assert logits.shape == (batch, posn, d_vocab)
    assert logits.dtype == normalized_resid_final.dtype
    max_err = float(jnp.max(jnp.abs(logits - ref)))
    assert jnp.allclose(logits, ref, atol=1e-3, rtol=1e-3), max_err

    print("KERNEL_OK")
</pallas_src>

<mosaic_0001>
module attributes {stable_mosaic.version = 11 : i64} {
  func.func @_unembed_kernel(%arg0: i32, %arg1: i32, %arg2: memref<128x128xbf16, #tpu.memory_space<vmem>>, %arg3: memref<128x1024xbf16, #tpu.memory_space<vmem>>, %arg4: memref<1x1024xf32, #tpu.memory_space<vmem>>, %arg5: memref<128x1024xf32, #tpu.memory_space<vmem>>) attributes {dimension_semantics = [#tpu.dimension_semantics<parallel>, #tpu.dimension_semantics<parallel>], iteration_bounds = array<i64: 1, 2>, scalar_prefetch = 0 : i64, scratch_operands = 0 : i64, tpu.core_type = #tpu.core_type<tc>, window_params = [{transform_indices = @transform_0, window_bounds = array<i64: 128, 128>}, {transform_indices = @transform_1, window_bounds = array<i64: 128, 1024>}, {transform_indices = @transform_2, window_bounds = array<i64: 1, 1024>}, {transform_indices = @transform_3, window_bounds = array<i64: 128, 1024>}]} {
    %c0 = arith.constant 0 : index
    %c0_0 = arith.constant 0 : index
    %0 = vector.load %arg2[%c0, %c0_0] : memref<128x128xbf16, #tpu.memory_space<vmem>>, vector<128x128xbf16>
    %c0_1 = arith.constant 0 : index
    %c0_2 = arith.constant 0 : index
    %1 = vector.load %arg3[%c0_1, %c0_2] : memref<128x1024xbf16, #tpu.memory_space<vmem>>, vector<128x1024xbf16>
    %cst = arith.constant dense<0.000000e+00> : vector<128x1024xf32>
    %2 = tpu.matmul %0, %1, %cst {dimension_numbers = #tpu.dot_dimension_numbers<[1], [0], [0], [1], [0, 0, 1, 1], [], []>} : vector<128x128xbf16>, vector<128x1024xbf16>, vector<128x1024xf32> -> vector<128x1024xf32>
    %c0_3 = arith.constant 0 : index
    %c0_4 = arith.constant 0 : index
    %3 = vector.load %arg4[%c0_3, %c0_4] : memref<1x1024xf32, #tpu.memory_space<vmem>>, vector<1x1024xf32>
    %4 = vector.broadcast %3 : vector<1x1024xf32> to vector<128x1024xf32>
    %5 = arith.addf %2, %4 : vector<128x1024xf32>
    %c0_5 = arith.constant 0 : index
    %c0_6 = arith.constant 0 : index
    %6 = vector.load %arg5[%c0_5, %c0_6] : memref<128x1024xf32, #tpu.memory_space<vmem>>, vector<128x1024xf32>
    tpu.vector_store %arg5[%c0_5, %c0_6], %5 {strides = array<i32>} : memref<128x1024xf32, #tpu.memory_space<vmem>>, vector<128x1024xf32>,
    return
  }
  func.func @transform_0(%arg0: i32, %arg1: i32) -> (i32, i32) {
    %c0_i32 = arith.constant 0 : i32
    %c0_i32_0 = arith.constant 0 : i32
    return %arg0, %c0_i32 : i32, i32
  }
  func.func @transform_1(%arg0: i32, %arg1: i32) -> (i32, i32) {
    %c0_i32 = arith.constant 0 : i32
    %c0_i32_0 = arith.constant 0 : i32
    return %c0_i32, %arg1 : i32, i32
  }
  func.func @transform_2(%arg0: i32, %arg1: i32) -> (i32, i32) {
    %c0_i32 = arith.constant 0 : i32
    %c0_i32_0 = arith.constant 0 : i32
    return %c0_i32, %arg1 : i32, i32
  }
  func.func @transform_3(%arg0: i32, %arg1: i32) -> (i32, i32) {
    %c0_i32 = arith.constant 0 : i32
    return %arg0, %arg1 : i32, i32
  }
}

</mosaic_0001>

<bundles_post_ra>
// kernel: unembed.1
= control target key start
LH: loop header
LB: loop body
LE: loop exit
PB: predicated region body
PF: predicated region fallthrough
CT: control target
= control target key end

     0   :  { %s2017_s12 = smov 0   ;;  %s2019_s13 = smov 0   ;;  %s2921_s0 = inlined_call_operand.vmem [shape: bf16[128,128], index: 0, kind: input, shape index: {}]   ;;  %s2922_s1 = inlined_call_operand.vmem [shape: bf16[128,2048], index: 1, kind: input, shape index: {}]   ;;  %s2923_s2 = inlined_call_operand.vmem [shape: f32[1,2048], index: 2, kind: input, shape index: {}]   ;;  %s2924_s3 = inlined_call_operand.vmem [shape: f32[128,2048], index: 3, kind: output, shape index: {}]  }
   0x1   :  { %s2021_s14 = smov 0   ;;  %s2023_s15 = smov 0  }
   0x2   :  { %s2025_s16 = smov 0  }
   0x3 LB: > { %s22_s17 = sadd.s32 1, %s1990_s15  ;;  %s1816_s18 = sadd.s32 4294967295, %s1994_s16   ;;  %s1994_s16 = sphi %s2025_s16, %s13_s16   ;;  %s1990_s15 = sphi %s2023_s15, %s2929_s15   ;;  %s1986_s14 = sphi %s2021_s14, %s2928_s14   ;;  %s1982_s13 = sphi %s2019_s13, %s2927_s13   ;;  %s1978_s12 = sphi %s2017_s12, %s2926_s12  }
   0x4   : > { %p23_p0 = scmp.ge.s32.totalorder %s22_s17, 2  ;;  %p65_p1 = scmp.ne.s32.totalorder %s1982_s13, %s1978_s12 }
   0x5   : > { %p66_p2 = scmp.eq.s32.totalorder %s1994_s16, 0  ;;  %p123_p4 = scmp.eq.s32.totalorder %s1816_s18, 1 }
   0x6   : > { %s2931_s17 = smov (%p23_p0, %s22_s17), 0  ;;  %s58_s20 = sadd.s32 1, %s1982_s13 }
   0x7   : > { %p67_p3 = por %p66_p2, %p65_p1  ;;  %s55_s19 = ssub.s32 %s1990_s15, %s2931_s17 }
   0x8   : > { %p56_p5 = scmp.eq.s32.totalorder %s55_s19, 0  ;;  %p2052_p6 = por %p123_p4, %p65_p1 }
   0x9   : > { %p1820_p7 = scmp.ge.s32.totalorder %s1994_s16, 2 }
   0xa   : > { %s2057_s22 = scalar_select %p56_p5, %s1982_s13, %s58_s20  }
   0xb   : > { %154 = sbr.rel (%p1820_p7) target bundleno = 52 (0x34), region = 20 }
  0x10   : > { %157 = sbr.rel (!%p67_p3) target bundleno = 52 (0x34), region = 24  ;;  %s159_s23 = sand.u32 (%p67_p3), 1, %s1982_s13  }
  0x11   : > { %s1905_s24 = sshll.u32 (%p67_p3), %s1990_s15, 5  ;;  %s1821_s25 = sshll.u32 (%p67_p3), %s159_s23, 9 }
  0x12   : > { %s2065_s28 = scalar_lea.vmem (%p67_p3), %s2922_s1, %s1905_s24  ;;  %s2070_s29 = scalar_lea.vmem (%p67_p3), [#allocation2], %s1821_s25 }
  0x13   : > { %v177_v0 = vld [vmem:[%s2065_s28] sm:$0xff] (%p67_p3)  ;;  %v179_v1 = vld [vmem:[%s2065_s28 + $0x8] sm:$0xff] (%p67_p3)  ;;  %v181_v2 = vld [vmem:[%s2065_s28 + $0x10] sm:$0xff] (%p67_p3) }
  0x14   : > { %178 = vst [vmem:[%s2070_s29] sm:$0xff] (%p67_p3), %v177_v0  ;;  %180 = vst [vmem:[%s2070_s29 + $0x8] sm:$0xff] (%p67_p3), %v179_v1  ;;  %v183_v3 = vld [vmem:[%s2065_s28 + $0x18] sm:$0xff] (%p67_p3)  ;;  %v185_v4 = vld [vmem:[%s2065_s28 + $0x40] sm:$0xff] (%p67_p3) }
  0x15   : > { %182 = vst [vmem:[%s2070_s29 + $0x10] sm:$0xff] %v181_v2  ;;  %v187_v5 = vld [vmem:[%s2065_s28 + $0x48] sm:$0xff]  ;;  %184 = vst [vmem:[%s2070_s29 + $0x18] sm:$0xff] %v183_v3  ;;  %v189_v6 = vld [vmem:[%s2065_s28 + $0x50] sm:$0xff] }
  0x16   : > { %186 = vst [vmem:[%s2070_s29 + $0x20] sm:$0xff] %v185_v4  ;;  %188 = vst [vmem:[%s2070_s29 + $0x28] sm:$0xff] %v187_v5  ;;  %v191_v7 = vld [vmem:[%s2065_s28 + $0x58] sm:$0xff]  ;;  %v193_v8 = vld [vmem:[%s2065_s28 + $0x80] sm:$0xff] }
  0x17   : > { %190 = vst [vmem:[%s2070_s29 + $0x30] sm:$0xff] %v189_v6  ;;  %192 = vst [vmem:[%s2070_s29 + $0x38] sm:$0xff] %v191_v7  ;;  %v195_v9 = vld [vmem:[%s2065_s28 + $0x88] sm:$0xff]  ;;  %v197_v10 = vld [vmem:[%s2065_s28 + $0x90] sm:$0xff] }
  0x18   : > { %194 = vst [vmem:[%s2070_s29 + $0x40] sm:$0xff] %v193_v8  ;;  %v199_v11 = vld [vmem:[%s2065_s28 + $0x98] sm:$0xff]  ;;  %196 = vst [vmem:[%s2070_s29 + $0x48] sm:$0xff] %v195_v9  ;;  %v201_v12 = vld [vmem:[%s2065_s28 + $0xc0] sm:$0xff] }
  0x19   : > { %198 = vst [vmem:[%s2070_s29 + $0x50] sm:$0xff] %v197_v10  ;;  %200 = vst [vmem:[%s2070_s29 + $0x58] sm:$0xff] %v199_v11  ;;  %v203_v13 = vld [vmem:[%s2065_s28 + $0xc8] sm:$0xff]  ;;  %v205_v14 = vld [vmem:[%s2065_s28 + $0xd0] sm:$0xff] }
  0x1a   : > { %202 = vst [vmem:[%s2070_s29 + $0x60] sm:$0xff] %v201_v12  ;;  %204 = vst [vmem:[%s2070_s29 + $0x68] sm:$0xff] %v203_v13  ;;  %v207_v15 = vld [vmem:[%s2065_s28 + $0xd8] sm:$0xff]  ;;  %v209_v16 = vld [vmem:[%s2065_s28 + $0x100] sm:$0xff] }
  0x1b   : > { %206 = vst [vmem:[%s2070_s29 + $0x70] sm:$0xff] %v205_v14  ;;  %v211_v17 = vld [vmem:[%s2065_s28 + $0x108] sm:$0xff]  ;;  %208 = vst [vmem:[%s2070_s29 + $0x78] sm:$0xff] %v207_v15  ;;  %v213_v18 = vld [vmem:[%s2065_s28 + $0x110] sm:$0xff] }
  0x1c   : > { %210 = vst [vmem:[%s2070_s29 + $0x80] sm:$0xff] %v209_v16  ;;  %212 = vst [vmem:[%s2070_s29 + $0x88] sm:$0xff] %v211_v17  ;;  %v215_v19 = vld [vmem:[%s2065_s28 + $0x118] sm:$0xff]  ;;  %v217_v20 = vld [vmem:[%s2065_s28 + $0x140] sm:$0xff] }
  0x1d   : > { %214 = vst [vmem:[%s2070_s29 + $0x90] sm:$0xff] %v213_v18  ;;  %216 = vst [vmem:[%s2070_s29 + $0x98] sm:$0xff] %v215_v19  ;;  %v219_v21 = vld [vmem:[%s2065_s28 + $0x148] sm:$0xff]  ;;  %v221_v22 = vld [vmem:[%s2065_s28 + $0x150] sm:$0xff] }
  0x1e   : > { %218 = vst [vmem:[%s2070_s29 + $0xa0] sm:$0xff] %v217_v20  ;;  %v223_v23 = vld [vmem:[%s2065_s28 + $0x158] sm:$0xff]  ;;  %220 = vst [vmem:[%s2070_s29 + $0xa8] sm:$0xff] %v219_v21  ;;  %v225_v24 = vld [vmem:[%s2065_s28 + $0x180] sm:$0xff] }
  0x1f   : > { %222 = vst [vmem:[%s2070_s29 + $0xb0] sm:$0xff] %v221_v22  ;;  %224 = vst [vmem:[%s2070_s29 + $0xb8] sm:$0xff] %v223_v23  ;;  %v227_v25 = vld [vmem:[%s2065_s28 + $0x188] sm:$0xff]  ;;  %v229_v26 = vld [vmem:[%s2065_s28 + $0x190] sm:$0xff] }
  0x20   : > { %226 = vst [vmem:[%s2070_s29 + $0xc0] sm:$0xff] %v225_v24  ;;  %228 = vst [vmem:[%s2070_s29 + $0xc8] sm:$0xff] %v227_v25  ;;  %v231_v27 = vld [vmem:[%s2065_s28 + $0x198] sm:$0xff]  ;;  %v233_v28 = vld [vmem:[%s2065_s28 + $0x1c0] sm:$0xff] }
  0x21   : > { %230 = vst [vmem:[%s2070_s29 + $0xd0] sm:$0xff] %v229_v26  ;;  %v235_v29 = vld [vmem:[%s2065_s28 + $0x1c8] sm:$0xff]  ;;  %232 = vst [vmem:[%s2070_s29 + $0xd8] sm:$0xff] %v231_v27  ;;  %v237_v30 = vld [vmem:[%s2065_s28 + $0x1d0] sm:$0xff] }
  0x22   : > { %234 = vst [vmem:[%s2070_s29 + $0xe0] sm:$0xff] %v233_v28  ;;  %236 = vst [vmem:[%s2070_s29 + $0xe8] sm:$0xff] %v235_v29  ;;  %v239_v31 = vld [vmem:[%s2065_s28 + $0x1d8] sm:$0xff]  ;;  %v241_v32 = vld [vmem:[%s2065_s28 + $0x200] sm:$0xff] }
  0x23   : > { %238 = vst [vmem:[%s2070_s29 + $0xf0] sm:$0xff] %v237_v30  ;;  %240 = vst [vmem:[%s2070_s29 + $0xf8] sm:$0xff] %v239_v31  ;;  %v243_v33 = vld [vmem:[%s2065_s28 + $0x208] sm:$0xff]  ;;  %v245_v34 = vld [vmem:[%s2065_s28 + $0x210] sm:$0xff] }
  0x24   : > { %242 = vst [vmem:[%s2070_s29 + $0x100] sm:$0xff] %v241_v32  ;;  %v247_v35 = vld [vmem:[%s2065_s28 + $0x218] sm:$0xff]  ;;  %244 = vst [vmem:[%s2070_s29 + $0x108] sm:$0xff] %v243_v33  ;;  %v249_v36 = vld [vmem:[%s2065_s28 + $0x240] sm:$0xff] }
  0x25   : > { %246 = vst [vmem:[%s2070_s29 + $0x110] sm:$0xff] %v245_v34  ;;  %248 = vst [vmem:[%s2070_s29 + $0x118] sm:$0xff] %v247_v35  ;;  %v251_v37 = vld [vmem:[%s2065_s28 + $0x248] sm:$0xff]  ;;  %v253_v38 = vld [vmem:[%s2065_s28 + $0x250] sm:$0xff] }
  0x26   : > { %250 = vst [vmem:[%s2070_s29 + $0x120] sm:$0xff] %v249_v36  ;;  %252 = vst [vmem:[%s2070_s29 + $0x128] sm:$0xff] %v251_v37  ;;  %v255_v39 = vld [vmem:[%s2065_s28 + $0x258] sm:$0xff]  ;;  %v257_v40 = vld [vmem:[%s2065_s28 + $0x280] sm:$0xff] }
  0x27   : > { %254 = vst [vmem:[%s2070_s29 + $0x130] sm:$0xff] %v253_v38  ;;  %v259_v41 = vld [vmem:[%s2065_s28 + $0x288] sm:$0xff]  ;;  %256 = vst [vmem:[%s2070_s29 + $0x138] sm:$0xff] %v255_v39  ;;  %v261_v42 = vld [vmem:[%s2065_s28 + $0x290] sm:$0xff] }
  0x28   : > { %258 = vst [vmem:[%s2070_s29 + $0x140] sm:$0xff] %v257_v40  ;;  %260 = vst [vmem:[%s2070_s29 + $0x148] sm:$0xff] %v259_v41  ;;  %v263_v43 = vld [vmem:[%s2065_s28 + $0x298] sm:$0xff]  ;;  %v265_v44 = vld [vmem:[%s2065_s28 + $0x2c0] sm:$0xff] }
  0x29   : > { %262 = vst [vmem:[%s2070_s29 + $0x150] sm:$0xff] %v261_v42  ;;  %264 = vst [vmem:[%s2070_s29 + $0x158] sm:$0xff] %v263_v43  ;;  %v267_v45 = vld [vmem:[%s2065_s28 + $0x2c8] sm:$0xff]  ;;  %v269_v46 = vld [vmem:[%s2065_s28 + $0x2d0] sm:$0xff] }
  0x2a   : > { %266 = vst [vmem:[%s2070_s29 + $0x160] sm:$0xff] %v265_v44  ;;  %v271_v47 = vld [vmem:[%s2065_s28 + $0x2d8] sm:$0xff]  ;;  %268 = vst [vmem:[%s2070_s29 + $0x168] sm:$0xff] %v267_v45  ;;  %v273_v48 = vld [vmem:[%s2065_s28 + $0x300] sm:$0xff] }
  0x2b   : > { %270 = vst [vmem:[%s2070_s29 + $0x170] sm:$0xff] %v269_v46  ;;  %272 = vst [vmem:[%s2070_s29 + $0x178] sm:$0xff] %v271_v47  ;;  %v275_v49 = vld [vmem:[%s2065_s28 + $0x308] sm:$0xff]  ;;  %v277_v50 = vld [vmem:[%s2065_s28 + $0x310] sm:$0xff] }
  0x2c   : > { %274 = vst [vmem:[%s2070_s29 + $0x180] sm:$0xff] %v273_v48  ;;  %276 = vst [vmem:[%s2070_s29 + $0x188] sm:$0xff] %v275_v49  ;;  %v279_v51 = vld [vmem:[%s2065_s28 + $0x318] sm:$0xff]  ;;  %v281_v52 = vld [vmem:[%s2065_s28 + $0x340] sm:$0xff] }
  0x2d   : > { %278 = vst [vmem:[%s2070_s29 + $0x190] sm:$0xff] %v277_v50  ;;  %v283_v53 = vld [vmem:[%s2065_s28 + $0x348] sm:$0xff]  ;;  %280 = vst [vmem:[%s2070_s29 + $0x198] sm:$0xff] %v279_v51  ;;  %v285_v54 = vld [vmem:[%s2065_s28 + $0x350] sm:$0xff] }
  0x2e   : > { %282 = vst [vmem:[%s2070_s29 + $0x1a0] sm:$0xff] %v281_v52  ;;  %284 = vst [vmem:[%s2070_s29 + $0x1a8] sm:$0xff] %v283_v53  ;;  %v287_v55 = vld [vmem:[%s2065_s28 + $0x358] sm:$0xff]  ;;  %v289_v56 = vld [vmem:[%s2065_s28 + $0x380] sm:$0xff] }
  0x2f   : > { %286 = vst [vmem:[%s2070_s29 + $0x1b0] sm:$0xff] %v285_v54  ;;  %288 = vst [vmem:[%s2070_s29 + $0x1b8] sm:$0xff] %v287_v55  ;;  %v291_v57 = vld [vmem:[%s2065_s28 + $0x388] sm:$0xff]  ;;  %v293_v58 = vld [vmem:[%s2065_s28 + $0x390] sm:$0xff] }
  0x30   : > { %290 = vst [vmem:[%s2070_s29 + $0x1c0] sm:$0xff] %v289_v56  ;;  %v295_v59 = vld [vmem:[%s2065_s28 + $0x398] sm:$0xff]  ;;  %292 = vst [vmem:[%s2070_s29 + $0x1c8] sm:$0xff] %v291_v57  ;;  %v297_v60 = vld [vmem:[%s2065_s28 + $0x3c0] sm:$0xff] }
  0x31   : > { %294 = vst [vmem:[%s2070_s29 + $0x1d0] sm:$0xff] %v293_v58  ;;  %296 = vst [vmem:[%s2070_s29 + $0x1d8] sm:$0xff] %v295_v59  ;;  %v299_v61 = vld [vmem:[%s2065_s28 + $0x3c8] sm:$0xff]  ;;  %v301_v62 = vld [vmem:[%s2065_s28 + $0x3d0] sm:$0xff] }
  0x32   : > { %298 = vst [vmem:[%s2070_s29 + $0x1e0] sm:$0xff] %v297_v60  ;;  %300 = vst [vmem:[%s2070_s29 + $0x1e8] sm:$0xff] %v299_v61  ;;  %v303_v63 = vld [vmem:[%s2065_s28 + $0x3d8] sm:$0xff] }
  0x33   : > { %302 = vst [vmem:[%s2070_s29 + $0x1f0] sm:$0xff] %v301_v62  ;;  %304 = vst [vmem:[%s2070_s29 + $0x1f8] sm:$0xff] %v303_v63 }
  0x34 PF: > { %p1824_p8 = scmp.ge.s32.totalorder %s1994_s16, 1  ;;  %p317_p9 = scmp.lt.s32.totalorder %s1994_s16, 3 }
  0x36   : > { %p318_p10 = pnand %p1824_p8, %p317_p9 }
  0x37   : > { %s324_s30 = sand.u32 (!%p318_p10), 1, %s1978_s12  }
  0x38   : > { %321 = sbr.rel (%p318_p10) target bundleno = 468 (0x1d4), region = 51  ;;  %s1825_s4 = sshll.u32 (!%p318_p10), %s324_s30, 9 }
  0x39   : > { %s2204_s5 = scalar_lea.vmem (!%p318_p10), [#allocation2], %s1825_s4  ;;  %s1827_s4 = sshll.u32 (!%p318_p10), %s1986_s14, 3 }
  0x3a   : > { %p363_p11 = scmp.lt.s32.totalorder (!%p318_p10), %s1827_s4, 15  ;;  %s1826_s8 = sshll.u32 (!%p318_p10), %s324_s30, 10 }
  0x3b   : > { %s2370_s12 = scalar_lea.vmem (!%p318_p10), [#allocation3], %s1826_s8 }
  0x3d   : > { %v1996_v0 = vmov 0   ;;  %v442_v1 = vld [vmem:[%s2204_s5 + $0x1c0] sm:$0xff]  ;;  %v443_v3 = vld [vmem:[%s2204_s5 + $0x1c8] sm:$0xff]  ;;  %v444_v63 = vld [vmem:[%s2204_s5 + $0x1d0] sm:$0xff]  ;;  %s2933_s4 = smov (!%p363_p11, %s1827_s4), 15  ;;  %s1906_s30 = sshll.u32 (%p2052_p6), %s1986_s14, 6 }
  0x3e   : > { %892 = vmatprep.mubr.bf16.mxu0 %v1996_v0  ;;  %1005 = vmatprep.mubr.bf16.mxu1 %v1996_v0  ;;  %v446_v2 = vld [vmem:[%s2204_s5 + $0x1e0] sm:$0xff]  ;;  %v447_v5 = vld [vmem:[%s2204_s5 + $0x1e8] sm:$0xff]  ;;  %s365_s7 = scalar_lea.vmem %s2923_s2, %s2933_s4  ;;  %s2651_s11 = scalar_lea.vmem (%p2052_p6), %s2924_s3, %s1906_s30 }
  0x3f   : > { %v1893_v4 = vcombine.high %v442_v1, %v446_v2  ;;  %v1892_v6 = vcombine.low %v442_v1, %v446_v2  ;;  %v434_v7 = vld [vmem:[%s2204_s5 + $0x180] sm:$0xff]  ;;  %v1895_v9 = vcombine.high %v443_v3, %v447_v5  ;;  %v1894_v10 = vcombine.low %v443_v3, %v447_v5  ;;  %v435_v12 = vld [vmem:[%s2204_s5 + $0x188] sm:$0xff]  ;;  %v448_v1 = vld [vmem:[%s2204_s5 + $0x1f0] sm:$0xff] }
  0x40   : > { %v438_v8 = vld [vmem:[%s2204_s5 + $0x1a0] sm:$0xff]  ;;  %v439_v13 = vld [vmem:[%s2204_s5 + $0x1a8] sm:$0xff]  ;;  %v445_v2 = vld [vmem:[%s2204_s5 + $0x1d8] sm:$0xff] }
  0x41   : > { %v1885_v11 = vcombine.high %v434_v7, %v438_v8  ;;  %v426_v14 = vld [vmem:[%s2204_s5 + $0x140] sm:$0xff]  ;;  %860 = vmatprep.subr.bf16.mxu0 %v1893_v4  ;;  %v1887_v15 = vcombine.high %v435_v12, %v439_v13  ;;  %v427_v17 = vld [vmem:[%s2204_s5 + $0x148] sm:$0xff]  ;;  %973 = vmatprep.subr.bf16.mxu1 %v1895_v9  ;;  %v1884_v19 = vcombine.low %v434_v7, %v438_v8  ;;  %v449_v3 = vld [vmem:[%s2204_s5 + $0x1f8] sm:$0xff] }
  0x42   : > { %v430_v16 = vld [vmem:[%s2204_s5 + $0x160] sm:$0xff]  ;;  %v431_v18 = vld [vmem:[%s2204_s5 + $0x168] sm:$0xff]  ;;  %861 = vmatpush1.bf16.msra.mxu0 %v1892_v6  ;;  %974 = vmatpush1.bf16.msra.mxu1 %v1894_v10  ;;  %v1886_v20 = vcombine.low %v435_v12, %v439_v13  ;;  %v1897_v6 = vcombine.high %v444_v63, %v448_v1  ;;  %v1899_v7 = vcombine.high %v445_v2, %v449_v3  ;;  %v436_v9 = vld [vmem:[%s2204_s5 + $0x190] sm:$0xff] }
  0x43   : > { %862 = vmatprep.subr.bf16.mxu0 %v1885_v11  ;;  %v1877_v21 = vcombine.high %v426_v14, %v430_v16  ;;  %975 = vmatprep.subr.bf16.mxu1 %v1887_v15  ;;  %v1879_v22 = vcombine.high %v427_v17, %v431_v18  ;;  %v418_v23 = vld [vmem:[%s2204_s5 + $0x100] sm:$0xff]  ;;  %v419_v25 = vld [vmem:[%s2204_s5 + $0x108] sm:$0xff]  ;;  %v1876_v27 = vcombine.low %v426_v14, %v430_v16  ;;  %v440_v10 = vld [vmem:[%s2204_s5 + $0x1b0] sm:$0xff] }
  0x44   : > { %v422_v24 = vld [vmem:[%s2204_s5 + $0x120] sm:$0xff]  ;;  %v423_v26 = vld [vmem:[%s2204_s5 + $0x128] sm:$0xff]  ;;  %v1878_v28 = vcombine.low %v427_v17, %v431_v18  ;;  %v1896_v11 = vcombine.low %v444_v63, %v448_v1  ;;  %v437_v12 = vld [vmem:[%s2204_s5 + $0x198] sm:$0xff]  ;;  %v1898_v14 = vcombine.low %v445_v2, %v449_v3  ;;  %v1889_v15 = vcombine.high %v436_v9, %v440_v10 }
  0x45   : > { %v1869_v29 = vcombine.high %v418_v23, %v422_v24  ;;  %v1871_v30 = vcombine.high %v419_v25, %v423_v26  ;;  %v410_v31 = vld [vmem:[%s2204_s5 + $0xc0] sm:$0xff]  ;;  %v411_v33 = vld [vmem:[%s2204_s5 + $0xc8] sm:$0xff]  ;;  %v1868_v35 = vcombine.low %v418_v23, %v422_v24  ;;  %v1870_v36 = vcombine.low %v419_v25, %v423_v26  ;;  %v441_v13 = vld [vmem:[%s2204_s5 + $0x1b8] sm:$0xff] }
  0x46   : > { %863 = vmatpush1.bf16.msra.mxu0 %v1884_v19  ;;  %976 = vmatpush1.bf16.msra.mxu1 %v1886_v20  ;;  %v414_v32 = vld [vmem:[%s2204_s5 + $0xe0] sm:$0xff]  ;;  %v415_v34 = vld [vmem:[%s2204_s5 + $0xe8] sm:$0xff]  ;;  %v428_v16 = vld [vmem:[%s2204_s5 + $0x150] sm:$0xff]  ;;  %v1891_v18 = vcombine.high %v437_v12, %v441_v13 }
  0x47   : > { %864 = vmatprep.subr.bf16.mxu0 %v1877_v21  ;;  %977 = vmatprep.subr.bf16.mxu1 %v1879_v22  ;;  %v1861_v37 = vcombine.high %v410_v31, %v414_v32  ;;  %v1863_v38 = vcombine.high %v411_v33, %v415_v34  ;;  %v402_v39 = vld [vmem:[%s2204_s5 + $0x80] sm:$0xff]  ;;  %v403_v41 = vld [vmem:[%s2204_s5 + $0x88] sm:$0xff]  ;;  %v1860_v43 = vcombine.low %v410_v31, %v414_v32  ;;  %v432_v17 = vld [vmem:[%s2204_s5 + $0x170] sm:$0xff] }
  0x48   : > { %v406_v40 = vld [vmem:[%s2204_s5 + $0xa0] sm:$0xff]  ;;  %v407_v42 = vld [vmem:[%s2204_s5 + $0xa8] sm:$0xff]  ;;  %v1862_v44 = vcombine.low %v411_v33, %v415_v34  ;;  %v429_v19 = vld [vmem:[%s2204_s5 + $0x158] sm:$0xff]  ;;  %v1888_v21 = vcombine.low %v436_v9, %v440_v10  ;;  %v1890_v22 = vcombine.low %v437_v12, %v441_v13  ;;  %v1881_v23 = vcombine.high %v428_v16, %v432_v17 }
  0x49   : > { %v1853_v45 = vcombine.high %v402_v39, %v406_v40  ;;  %v1855_v46 = vcombine.high %v403_v41, %v407_v42  ;;  %v394_v47 = vld [vmem:[%s2204_s5 + $0x40] sm:$0xff]  ;;  %v395_v49 = vld [vmem:[%s2204_s5 + $0x48] sm:$0xff]  ;;  %v1852_v51 = vcombine.low %v402_v39, %v406_v40  ;;  %v1854_v52 = vcombine.low %v403_v41, %v407_v42  ;;  %v433_v20 = vld [vmem:[%s2204_s5 + $0x178] sm:$0xff] }
  0x4a   : > { %865 = vmatpush1.bf16.msra.mxu0 %v1876_v27  ;;  %978 = vmatpush1.bf16.msra.mxu1 %v1878_v28  ;;  %v398_v48 = vld [vmem:[%s2204_s5 + $0x60] sm:$0xff]  ;;  %v399_v50 = vld [vmem:[%s2204_s5 + $0x68] sm:$0xff]  ;;  %v1883_v24 = vcombine.high %v429_v19, %v433_v20  ;;  %v420_v26 = vld [vmem:[%s2204_s5 + $0x110] sm:$0xff]  ;;  %v1882_v31 = vcombine.low %v429_v19, %v433_v20 }
  0x4b   : > { %866 = vmatprep.subr.bf16.mxu0 %v1869_v29  ;;  %979 = vmatprep.subr.bf16.mxu1 %v1871_v30  ;;  %v1845_v53 = vcombine.high %v394_v47, %v398_v48  ;;  %v386_v54 = vld [vmem:[%s2204_s5] sm:$0xff]  ;;  %v1847_v55 = vcombine.high %v395_v49, %v399_v50  ;;  %v387_v57 = vld [vmem:[%s2204_s5 + $0x8] sm:$0xff]  ;;  %v1844_v59 = vcombine.low %v394_v47, %v398_v48  ;;  %v424_v27 = vld [vmem:[%s2204_s5 + $0x130] sm:$0xff] }
  0x4c   : > { %v390_v56 = vld [vmem:[%s2204_s5 + $0x20] sm:$0xff]  ;;  %v391_v58 = vld [vmem:[%s2204_s5 + $0x28] sm:$0xff]  ;;  %v1846_v60 = vcombine.low %v395_v49, %v399_v50  ;;  %v421_v28 = vld [vmem:[%s2204_s5 + $0x118] sm:$0xff]  ;;  %v1880_v30 = vcombine.low %v428_v16, %v432_v17  ;;  %v1873_v32 = vcombine.high %v420_v26, %v424_v27 }
  0x4d   : > { %v1837_v61 = vcombine.high %v386_v54, %v390_v56  ;;  %v1839_v62 = vcombine.high %v387_v57, %v391_v58  ;;  %v1836_v4 = vcombine.low %v386_v54, %v390_v56  ;;  %v1838_v5 = vcombine.low %v387_v57, %v391_v58  ;;  %v2245_v8 = vld [vmem:[%s2921_s0] sm:$0xff]   ;;  %v2262_v25 = vld [vmem:[%s2921_s0 + $0x8] sm:$0xff]   ;;  %v425_v29 = vld [vmem:[%s2204_s5 + $0x138] sm:$0xff] }
  0x4e   : > { %867 = vmatpush1.bf16.msra.mxu0 %v1868_v35  ;;  %980 = vmatpush1.bf16.msra.mxu1 %v1870_v36  ;;  %v1875_v33 = vcombine.high %v421_v28, %v425_v29  ;;  %v412_v34 = vld [vmem:[%s2204_s5 + $0xd0] sm:$0xff]  ;;  %v413_v36 = vld [vmem:[%s2204_s5 + $0xd8] sm:$0xff]  ;;  %v1874_v39 = vcombine.low %v421_v28, %v425_v29  ;;  %v1953_v9 = vld [vmem:[%s2921_s0 + $0x28] sm:$0xff]  }
  0x4f   : > { %868 = vmatprep.subr.bf16.mxu0 %v1861_v37  ;;  %981 = vmatprep.subr.bf16.mxu1 %v1863_v38  ;;  %v416_v35 = vld [vmem:[%s2204_s5 + $0xf0] sm:$0xff]  ;;  %v417_v37 = vld [vmem:[%s2204_s5 + $0xf8] sm:$0xff]  ;;  %v1872_v38 = vcombine.low %v420_v26, %v424_v27 }
  0x50   : > { %v1865_v40 = vcombine.high %v412_v34, %v416_v35  ;;  %v2279_v41 = vld [vmem:[%s2921_s0 + $0x10] sm:$0xff]   ;;  %v1867_v42 = vcombine.high %v413_v36, %v417_v37  ;;  %v1864_v47 = vcombine.low %v412_v34, %v416_v35  ;;  %v1866_v48 = vcombine.low %v413_v36, %v417_v37  ;;  %v401_v54 = vld [vmem:[%s2204_s5 + $0x78] sm:$0xff] }
  0x51   : > { %v1951_v58 = vld [vmem:[%s2921_s0 + $0x18] sm:$0xff]   ;;  %v1954_v10 = vld [vmem:[%s2921_s0 + $0x30] sm:$0xff]  }
  0x52   : > { %869 = vmatpush1.bf16.msra.mxu0 %v1860_v43  ;;  %982 = vmatpush1.bf16.msra.mxu1 %v1862_v44  ;;  %v404_v43 = vld [vmem:[%s2204_s5 + $0x90] sm:$0xff]  ;;  %v393_v63 = vld [vmem:[%s2204_s5 + $0x38] sm:$0xff] }
  0x53   : > { %870 = vmatprep.subr.bf16.mxu0 %v1853_v45  ;;  %983 = vmatprep.subr.bf16.mxu1 %v1855_v46  ;;  %v408_v44 = vld [vmem:[%s2204_s5 + $0xb0] sm:$0xff]  ;;  %v405_v45 = vld [vmem:[%s2204_s5 + $0x98] sm:$0xff] }
  0x54   : > { %v409_v46 = vld [vmem:[%s2204_s5 + $0xb8] sm:$0xff]  ;;  %v1857_v49 = vcombine.high %v404_v43, %v408_v44 }
  0x55   : > { %v1859_v50 = vcombine.high %v405_v45, %v409_v46  ;;  %v1858_v56 = vcombine.low %v405_v45, %v409_v46 }
  0x56   : > { %871 = vmatpush1.bf16.msra.mxu0 %v1852_v51  ;;  %984 = vmatpush1.bf16.msra.mxu1 %v1854_v52  ;;  %v396_v51 = vld [vmem:[%s2204_s5 + $0x50] sm:$0xff] }
  0x57   : > { %872 = vmatprep.subr.bf16.mxu0 %v1845_v53  ;;  %985 = vmatprep.subr.bf16.mxu1 %v1847_v55  ;;  %v400_v52 = vld [vmem:[%s2204_s5 + $0x70] sm:$0xff]  ;;  %v397_v53 = vld [vmem:[%s2204_s5 + $0x58] sm:$0xff]  ;;  %v1856_v55 = vcombine.low %v404_v43, %v408_v44 }
  0x58   : > { %v1849_v57 = vcombine.high %v396_v51, %v400_v52  ;;  %v1848_v1 = vcombine.low %v396_v51, %v400_v52  ;;  %v1850_v2 = vcombine.low %v397_v53, %v401_v54 }
  0x5a   : > { %873 = vmatpush1.bf16.msra.mxu0 %v1844_v59  ;;  %986 = vmatpush1.bf16.msra.mxu1 %v1846_v60  ;;  %v1851_v59 = vcombine.high %v397_v53, %v401_v54  ;;  %v388_v60 = vld [vmem:[%s2204_s5 + $0x10] sm:$0xff] }
  0x5b   : > { %874 = vmatprep.subr.bf16.mxu0 %v1837_v61  ;;  %987 = vmatprep.subr.bf16.mxu1 %v1839_v62  ;;  %v392_v61 = vld [vmem:[%s2204_s5 + $0x30] sm:$0xff]  ;;  %v389_v62 = vld [vmem:[%s2204_s5 + $0x18] sm:$0xff] }
  0x5c   : > { %v1841_v3 = vcombine.high %v388_v60, %v392_v61 }
  0x5e   : > { %875 = vmatpush1.bf16.msra.mxu0 %v1836_v4  ;;  %988 = vmatpush1.bf16.msra.mxu1 %v1838_v5  ;;  %v1843_v4 = vcombine.high %v389_v62, %v393_v63  ;;  %v1840_v5 = vcombine.low %v388_v60, %v392_v61 }
  0x5f   : > { %1086 = vmatprep.subr.bf16.mxu0 %v1897_v6  ;;  %1199 = vmatprep.subr.bf16.mxu1 %v1899_v7  ;;  %v1842_v6 = vcombine.low %v389_v62, %v393_v63  ;;  %v1952_v7 = vld [vmem:[%s2921_s0 + $0x20] sm:$0xff]  }
  0x61   : > { %893 = vmatmul.mubr.bf16.vlgmr.msra.gmra.mxu0 %v2245_v8  ;;  %1006 = vmatmul.mubr.bf16.vlgmr.msra.gmra.mxu1 %v2245_v8 }
  0x62   : > { %1087 = vmatpush1.bf16.msra.mxu0 %v1896_v11  ;;  %1200 = vmatpush1.bf16.msra.mxu1 %v1898_v14  ;;  %v1955_v11 = vld [vmem:[%s2921_s0 + $0x38] sm:$0xff]   ;;  %v2349_v14 = vld [vmem:[%s365_s7] sm:$0xff] }
  0x63   : > { %902 = vmatprep.mubr.bf16.mxu0 %v1996_v0  ;;  %1015 = vmatprep.mubr.bf16.mxu1 %v1996_v0 }
  0x64   : > { %1088 = vmatprep.subr.bf16.mxu0 %v1889_v15  ;;  %1201 = vmatprep.subr.bf16.mxu1 %v1891_v18 }
  0x66   : > { %1089 = vmatpush1.bf16.msra.mxu0 %v1888_v21  ;;  %1202 = vmatpush1.bf16.msra.mxu1 %v1890_v22 }
  0x67   : > { %1090 = vmatprep.subr.bf16.mxu0 %v1881_v23  ;;  %1203 = vmatprep.subr.bf16.mxu1 %v1883_v24 }
  0x69   : > { %903 = vmatmul.mubr.bf16.gmra.mxu0 %v2262_v25  ;;  %1016 = vmatmul.mubr.bf16.gmra.mxu1 %v2262_v25 }
  0x6a   : > { %912 = vmatprep.mubr.bf16.mxu0 %v1996_v0  ;;  %1025 = vmatprep.mubr.bf16.mxu1 %v1996_v0 }
  0x6b   : > { %1091 = vmatpush1.bf16.msra.mxu0 %v1880_v30  ;;  %1204 = vmatpush1.bf16.msra.mxu1 %v1882_v31 }
  0x6c   : > { %1092 = vmatprep.subr.bf16.mxu0 %v1873_v32  ;;  %1205 = vmatprep.subr.bf16.mxu1 %v1875_v33 }
  0x6f   : > { %1093 = vmatpush1.bf16.msra.mxu0 %v1872_v38  ;;  %1206 = vmatpush1.bf16.msra.mxu1 %v1874_v39 }
  0x70   : > { %1094 = vmatprep.subr.bf16.mxu0 %v1865_v40  ;;  %1207 = vmatprep.subr.bf16.mxu1 %v1867_v42 }
  0x71   : > { %913 = vmatmul.mubr.bf16.gmra.mxu0 %v2279_v41  ;;  %1026 = vmatmul.mubr.bf16.gmra.mxu1 %v2279_v41 }
  0x72   : > { %922 = vmatprep.mubr.bf16.mxu0 %v1996_v0  ;;  %1035 = vmatprep.mubr.bf16.mxu1 %v1996_v0 }
  0x73   : > { %1095 = vmatpush1.bf16.msra.mxu0 %v1864_v47  ;;  %1208 = vmatpush1.bf16.msra.mxu1 %v1866_v48 }
  0x74   : > { %1096 = vmatprep.subr.bf16.mxu0 %v1857_v49  ;;  %1209 = vmatprep.subr.bf16.mxu1 %v1859_v50 }
  0x77   : > { %1097 = vmatpush1.bf16.msra.mxu0 %v1856_v55  ;;  %1210 = vmatpush1.bf16.msra.mxu1 %v1858_v56 }
  0x78   : > { %1098 = vmatprep.subr.bf16.mxu0 %v1849_v57  ;;  %1211 = vmatprep.subr.bf16.mxu1 %v1851_v59 }
  0x79   : > { %923 = vmatmul.mubr.bf16.gmra.mxu0 %v1951_v58  ;;  %1036 = vmatmul.mubr.bf16.gmra.mxu1 %v1951_v58 }
  0x7a   : > { %932 = vmatprep.mubr.bf16.mxu0 %v1996_v0  ;;  %1045 = vmatprep.mubr.bf16.mxu1 %v1996_v0 }
  0x7b   : > { %1099 = vmatpush1.bf16.msra.mxu0 %v1848_v1  ;;  %1212 = vmatpush1.bf16.msra.mxu1 %v1850_v2 }
  0x7c   : > { %1100 = vmatprep.subr.bf16.mxu0 %v1841_v3  ;;  %1213 = vmatprep.subr.bf16.mxu1 %v1843_v4 }
  0x7f   : > { %1101 = vmatpush1.bf16.msra.mxu0 %v1840_v5  ;;  %1214 = vmatpush1.bf16.msra.mxu1 %v1842_v6 }
  0x81   : > { %933 = vmatmul.mubr.bf16.gmra.mxu0 %v1952_v7  ;;  %1046 = vmatmul.mubr.bf16.gmra.mxu1 %v1952_v7 }
  0x82   : > { %942 = vmatprep.mubr.bf16.mxu0 %v1996_v0  ;;  %1055 = vmatprep.mubr.bf16.mxu1 %v1996_v0 }
  0x89   : > { %943 = vmatmul.mubr.bf16.gmra.mxu0 %v1953_v9  ;;  %1056 = vmatmul.mubr.bf16.gmra.mxu1 %v1953_v9 }
  0x8a   : > { %952 = vmatprep.mubr.bf16.mxu0 %v1996_v0  ;;  %1065 = vmatprep.mubr.bf16.mxu1 %v1996_v0 }
  0x91   : > { %953 = vmatmul.mubr.bf16.gmra.mxu0 %v1954_v10  ;;  %1066 = vmatmul.mubr.bf16.gmra.mxu1 %v1954_v10 }
  0x92   : > { %962 = vmatprep.mubr.bf16.mxu0 %v1996_v0  ;;  %1075 = vmatprep.mubr.bf16.mxu1 %v1996_v0 }
  0x99   : > { %963 = vmatmul.mubr.bf16.gmra.mxu0 %v1955_v11  ;;  %1076 = vmatmul.mubr.bf16.gmra.mxu1 %v1955_v11 }
  0x9a   : > { %1118 = vmatprep.mubr.bf16.mxu0 %v1996_v0  ;;  %1231 = vmatprep.mubr.bf16.mxu1 %v1996_v0 }
  0xa1   : > { %1119 = vmatmul.mubr.bf16.vlgmr.msra.gmra.mxu0 %v2245_v8  ;;  %1232 = vmatmul.mubr.bf16.vlgmr.msra.gmra.mxu1 %v2245_v8  ;;  %v452_v8 = vlaneseq }
  0xa2   : > { %1128 = vmatprep.mubr.bf16.mxu0 %v1996_v0  ;;  %1241 = vmatprep.mubr.bf16.mxu1 %v1996_v0 }
  0xa3   : > { %v2343_v12 = vshrl.u32 %v452_v8, 7 }
  0xa5   : > { %v454_v13 = vsub.s32 0, %v2343_v12  ;;  %v462_v15 = vsub.s32 2, %v2343_v12  ;;  %v466_v16 = vsub.s32 3, %v2343_v12 }
  0xa7   : > { %v2357_v17 = vrot.slane %v2349_v14, %v454_v13  ;;  %v2360_v18 = vrot.slane %v2349_v14, %v462_v15  ;;  %v2366_v21 = vrot.slane %v2349_v14, %v466_v16 }
  0xa9   : > { %1129 = vmatmul.mubr.bf16.gmra.mxu0 %v2262_v25  ;;  %1242 = vmatmul.mubr.bf16.gmra.mxu1 %v2262_v25 }
  0xaa   : > { %1138 = vmatprep.mubr.bf16.mxu0 %v1996_v0  ;;  %1251 = vmatprep.mubr.bf16.mxu1 %v1996_v0 }
  0xb1   : > { %1139 = vmatmul.mubr.bf16.gmra.mxu0 %v2279_v41  ;;  %1252 = vmatmul.mubr.bf16.gmra.mxu1 %v2279_v41 }
  0xb2   : > { %1148 = vmatprep.mubr.bf16.mxu0 %v1996_v0  ;;  %1261 = vmatprep.mubr.bf16.mxu1 %v1996_v0 }
  0xb9   : > { %1149 = vmatmul.mubr.bf16.gmra.mxu0 %v1951_v58  ;;  %1262 = vmatmul.mubr.bf16.gmra.mxu1 %v1951_v58 }
  0xba   : > { %1158 = vmatprep.mubr.bf16.mxu0 %v1996_v0  ;;  %1271 = vmatprep.mubr.bf16.mxu1 %v1996_v0 }
  0xc1   : > { %1159 = vmatmul.mubr.bf16.gmra.mxu0 %v1952_v7  ;;  %1272 = vmatmul.mubr.bf16.gmra.mxu1 %v1952_v7 }
  0xc2   : > { %1168 = vmatprep.mubr.bf16.mxu0 %v1996_v0  ;;  %1281 = vmatprep.mubr.bf16.mxu1 %v1996_v0 }
  0xc9   : > { %1169 = vmatmul.mubr.bf16.gmra.mxu0 %v1953_v9  ;;  %1282 = vmatmul.mubr.bf16.gmra.mxu1 %v1953_v9 }
  0xca   : > { %1178 = vmatprep.mubr.bf16.mxu0 %v1996_v0  ;;  %1291 = vmatprep.mubr.bf16.mxu1 %v1996_v0 }
  0xd1   : > { %1179 = vmatmul.mubr.bf16.gmra.mxu0 %v1954_v10  ;;  %1292 = vmatmul.mubr.bf16.gmra.mxu1 %v1954_v10 }
  0xd2   : > { %1188 = vmatprep.mubr.bf16.mxu0 %v1996_v0  ;;  %1301 = vmatprep.mubr.bf16.mxu1 %v1996_v0  ;;  %v458_v0 = vsub.s32 1, %v2343_v12 }
  0xd4   : > { %v2363_v19 = vrot.slane %v2349_v14, %v458_v0 }
  0xd9   : > { %1189 = vmatmul.mubr.bf16.gmra.mxu0 %v1955_v11  ;;  %1302 = vmatmul.mubr.bf16.gmra.mxu1 %v1955_v11 }
 0x121   : > { %v894_v20 = vpop.f32.mrf.mxu0  ;;  %v1007_v23 = vpop.f32.mrf.mxu1 }
 0x122   : > { %v895_v22 = vadd.f32 %v894_v20, %v2357_v17  ;;  %v1008_v24 = vadd.f32 %v1007_v23, %v2360_v18 }
 0x123   : > { %v896_v25 = vpop.f32.mrf.mxu0  ;;  %v1009_v27 = vpop.f32.mrf.mxu1 }
 0x124   : > { %1312 = vst [vmem:[%s2370_s12] sm:$0xff] %v895_v22  ;;  %v897_v26 = vadd.f32 %v896_v25, %v2363_v19  ;;  %1314 = vst [vmem:[%s2370_s12 + $0x10] sm:$0xff] %v1008_v24  ;;  %v1010_v28 = vadd.f32 %v1009_v27, %v2366_v21 }
 0x125   : > { %v898_v29 = vpop.f32.mrf.mxu0  ;;  %v1011_v31 = vpop.f32.mrf.mxu1 }
 0x126   : > { %1313 = vst [vmem:[%s2370_s12 + $0x8] sm:$0xff] %v897_v26  ;;  %v899_v30 = vadd.f32 %v898_v29, %v2357_v17  ;;  %1315 = vst [vmem:[%s2370_s12 + $0x18] sm:$0xff] %v1010_v28  ;;  %v1012_v32 = vadd.f32 %v1011_v31, %v2360_v18 }
 0x127   : > { %v900_v33 = vpop.f32.mrf.mxu0  ;;  %v1013_v35 = vpop.f32.mrf.mxu1 }
 0x128   : > { %1320 = vst [vmem:[%s2370_s12 + $0x40] sm:$0xff] %v899_v30  ;;  %v901_v34 = vadd.f32 %v900_v33, %v2363_v19  ;;  %1322 = vst [vmem:[%s2370_s12 + $0x50] sm:$0xff] %v1012_v32  ;;  %v1014_v36 = vadd.f32 %v1013_v35, %v2366_v21 }
 0x129   : > { %v904_v37 = vpop.f32.mrf.mxu0  ;;  %v1017_v39 = vpop.f32.mrf.mxu1 }
 0x12a   : > { %1321 = vst [vmem:[%s2370_s12 + $0x48] sm:$0xff] %v901_v34  ;;  %v905_v38 = vadd.f32 %v904_v37, %v2357_v17  ;;  %1323 = vst [vmem:[%s2370_s12 + $0x58] sm:$0xff] %v1014_v36  ;;  %v1018_v40 = vadd.f32 %v1017_v39, %v2360_v18 }
 0x12b   : > { %v906_v41 = vpop.f32.mrf.mxu0  ;;  %v1019_v43 = vpop.f32.mrf.mxu1 }
 0x12c   : > { %1328 = vst [vmem:[%s2370_s12 + $0x80] sm:$0xff] %v905_v38  ;;  %v907_v42 = vadd.f32 %v906_v41, %v2363_v19  ;;  %1330 = vst [vmem:[%s2370_s12 + $0x90] sm:$0xff] %v1018_v40  ;;  %v1020_v44 = vadd.f32 %v1019_v43, %v2366_v21 }
 0x12d   : > { %v908_v45 = vpop.f32.mrf.mxu0  ;;  %v1021_v47 = vpop.f32.mrf.mxu1 }
 0x12e   : > { %1329 = vst [vmem:[%s2370_s12 + $0x88] sm:$0xff] %v907_v42  ;;  %v909_v46 = vadd.f32 %v908_v45, %v2357_v17  ;;  %1331 = vst [vmem:[%s2370_s12 + $0x98] sm:$0xff] %v1020_v44  ;;  %v1022_v48 = vadd.f32 %v1021_v47, %v2360_v18 }
 0x12f   : > { %v910_v49 = vpop.f32.mrf.mxu0  ;;  %v1023_v51 = vpop.f32.mrf.mxu1 }
 0x130   : > { %1336 = vst [vmem:[%s2370_s12 + $0xc0] sm:$0xff] %v909_v46  ;;  %v911_v50 = vadd.f32 %v910_v49, %v2363_v19  ;;  %1338 = vst [vmem:[%s2370_s12 + $0xd0] sm:$0xff] %v1022_v48  ;;  %v1024_v52 = vadd.f32 %v1023_v51, %v2366_v21 }
 0x131   : > { %v914_v53 = vpop.f32.mrf.mxu0  ;;  %v1027_v55 = vpop.f32.mrf.mxu1 }
 0x132   : > { %1337 = vst [vmem:[%s2370_s12 + $0xc8] sm:$0xff] %v911_v50  ;;  %v915_v54 = vadd.f32 %v914_v53, %v2357_v17  ;;  %1339 = vst [vmem:[%s2370_s12 + $0xd8] sm:$0xff] %v1024_v52  ;;  %v1028_v56 = vadd.f32 %v1027_v55, %v2360_v18 }
 0x133   : > { %v916_v57 = vpop.f32.mrf.mxu0  ;;  %v1029_v59 = vpop.f32.mrf.mxu1 }
 0x134   : > { %1344 = vst [vmem:[%s2370_s12 + $0x100] sm:$0xff] %v915_v54  ;;  %v917_v58 = vadd.f32 %v916_v57, %v2363_v19  ;;  %1346 = vst [vmem:[%s2370_s12 + $0x110] sm:$0xff] %v1028_v56  ;;  %v1030_v60 = vadd.f32 %v1029_v59, %v2366_v21 }
 0x135   : > { %v918_v61 = vpop.f32.mrf.mxu0  ;;  %v1031_v63 = vpop.f32.mrf.mxu1 }
 0x136   : > { %1345 = vst [vmem:[%s2370_s12 + $0x108] sm:$0xff] %v917_v58  ;;  %v919_v62 = vadd.f32 %v918_v61, %v2357_v17  ;;  %1347 = vst [vmem:[%s2370_s12 + $0x118] sm:$0xff] %v1030_v60  ;;  %v1032_v1 = vadd.f32 %v1031_v63, %v2360_v18 }
 0x137   : > { %v920_v2 = vpop.f32.mrf.mxu0  ;;  %v1033_v4 = vpop.f32.mrf.mxu1 }
 0x138   : > { %1352 = vst [vmem:[%s2370_s12 + $0x140] sm:$0xff] %v919_v62  ;;  %v921_v3 = vadd.f32 %v920_v2, %v2363_v19  ;;  %1354 = vst [vmem:[%s2370_s12 + $0x150] sm:$0xff] %v1032_v1  ;;  %v1034_v5 = vadd.f32 %v1033_v4, %v2366_v21 }
 0x139   : > { %v924_v6 = vpop.f32.mrf.mxu0  ;;  %v1037_v9 = vpop.f32.mrf.mxu1 }
 0x13a   : > { %1353 = vst [vmem:[%s2370_s12 + $0x148] sm:$0xff] %v921_v3  ;;  %v925_v7 = vadd.f32 %v924_v6, %v2357_v17  ;;  %1355 = vst [vmem:[%s2370_s12 + $0x158] sm:$0xff] %v1034_v5  ;;  %v1038_v10 = vadd.f32 %v1037_v9, %v2360_v18 }
 0x13b   : > { %v926_v11 = vpop.f32.mrf.mxu0  ;;  %v1039_v13 = vpop.f32.mrf.mxu1 }
 0x13c   : > { %1360 = vst [vmem:[%s2370_s12 + $0x180] sm:$0xff] %v925_v7  ;;  %v927_v8 = vadd.f32 %v926_v11, %v2363_v19  ;;  %1362 = vst [vmem:[%s2370_s12 + $0x190] sm:$0xff] %v1038_v10  ;;  %v1040_v15 = vadd.f32 %v1039_v13, %v2366_v21 }
 0x13d   : > { %v928_v0 = vpop.f32.mrf.mxu0  ;;  %v1041_v20 = vpop.f32.mrf.mxu1 }
 0x13e   : > { %1361 = vst [vmem:[%s2370_s12 + $0x188] sm:$0xff] %v927_v8  ;;  %v929_v16 = vadd.f32 %v928_v0, %v2357_v17  ;;  %1363 = vst [vmem:[%s2370_s12 + $0x198] sm:$0xff] %v1040_v15  ;;  %v1042_v22 = vadd.f32 %v1041_v20, %v2360_v18 }
 0x13f   : > { %v930_v23 = vpop.f32.mrf.mxu0  ;;  %v1043_v25 = vpop.f32.mrf.mxu1 }
 0x140   : > { %1368 = vst [vmem:[%s2370_s12 + $0x1c0] sm:$0xff] %v929_v16  ;;  %v931_v24 = vadd.f32 %v930_v23, %v2363_v19  ;;  %1370 = vst [vmem:[%s2370_s12 + $0x1d0] sm:$0xff] %v1042_v22  ;;  %v1044_v26 = vadd.f32 %v1043_v25, %v2366_v21  ;;  %v470_v16 = vsub.s32 4, %v2343_v12  ;;  %v478_v23 = vsub.s32 6, %v2343_v12 }
 0x141   : > { %v934_v27 = vpop.f32.mrf.mxu0  ;;  %v1047_v29 = vpop.f32.mrf.mxu1 }
 0x142   : > { %1369 = vst [vmem:[%s2370_s12 + $0x1c8] sm:$0xff] %v931_v24  ;;  %v935_v28 = vadd.f32 %v934_v27, %v2357_v17  ;;  %1371 = vst [vmem:[%s2370_s12 + $0x1d8] sm:$0xff] %v1044_v26  ;;  %v1048_v30 = vadd.f32 %v1047_v29, %v2360_v18  ;;  %v474_v26 = vsub.s32 5, %v2343_v12  ;;  %v482_v29 = vsub.s32 7, %v2343_v12 }
 0x143   : > { %v936_v31 = vpop.f32.mrf.mxu0  ;;  %v1049_v33 = vpop.f32.mrf.mxu1 }
 0x144   : > { %1376 = vst [vmem:[%s2370_s12 + $0x200] sm:$0xff] %v935_v28  ;;  %v937_v32 = vadd.f32 %v936_v31, %v2363_v19  ;;  %1378 = vst [vmem:[%s2370_s12 + $0x210] sm:$0xff] %v1048_v30  ;;  %v1050_v34 = vadd.f32 %v1049_v33, %v2366_v21 }
 0x145   : > { %v938_v35 = vpop.f32.mrf.mxu0  ;;  %v1051_v37 = vpop.f32.mrf.mxu1 }
 0x146   : > { %1377 = vst [vmem:[%s2370_s12 + $0x208] sm:$0xff] %v937_v32  ;;  %v939_v36 = vadd.f32 %v938_v35, %v2357_v17  ;;  %1379 = vst [vmem:[%s2370_s12 + $0x218] sm:$0xff] %v1050_v34  ;;  %v1052_v38 = vadd.f32 %v1051_v37, %v2360_v18  ;;  %v2495_v32 = vrot.slane %v2349_v14, %v470_v16 }
 0x147   : > { %v940_v39 = vpop.f32.mrf.mxu0  ;;  %v1053_v41 = vpop.f32.mrf.mxu1  ;;  %v2500_v35 = vrot.slane %v2349_v14, %v478_v23 }
 0x148   : > { %1384 = vst [vmem:[%s2370_s12 + $0x240] sm:$0xff] %v939_v36  ;;  %v941_v40 = vadd.f32 %v940_v39, %v2363_v19  ;;  %1386 = vst [vmem:[%s2370_s12 + $0x250] sm:$0xff] %v1052_v38  ;;  %v1054_v42 = vadd.f32 %v1053_v41, %v2366_v21 }
 0x149   : > { %v944_v43 = vpop.f32.mrf.mxu0  ;;  %v1057_v45 = vpop.f32.mrf.mxu1 }
 0x14a   : > { %1385 = vst [vmem:[%s2370_s12 + $0x248] sm:$0xff] %v941_v40  ;;  %v945_v44 = vadd.f32 %v944_v43, %v2357_v17  ;;  %1387 = vst [vmem:[%s2370_s12 + $0x258] sm:$0xff] %v1054_v42  ;;  %v1058_v46 = vadd.f32 %v1057_v45, %v2360_v18 }
 0x14b   : > { %v946_v47 = vpop.f32.mrf.mxu0  ;;  %v1059_v49 = vpop.f32.mrf.mxu1 }
 0x14c   : > { %1392 = vst [vmem:[%s2370_s12 + $0x280] sm:$0xff] %v945_v44  ;;  %v947_v48 = vadd.f32 %v946_v47, %v2363_v19  ;;  %1394 = vst [vmem:[%s2370_s12 + $0x290] sm:$0xff] %v1058_v46  ;;  %v1060_v50 = vadd.f32 %v1059_v49, %v2366_v21 }
 0x14d   : > { %v948_v51 = vpop.f32.mrf.mxu0  ;;  %v1061_v53 = vpop.f32.mrf.mxu1 }
 0x14e   : > { %1393 = vst [vmem:[%s2370_s12 + $0x288] sm:$0xff] %v947_v48  ;;  %v949_v52 = vadd.f32 %v948_v51, %v2357_v17  ;;  %1395 = vst [vmem:[%s2370_s12 + $0x298] sm:$0xff] %v1060_v50  ;;  %v1062_v54 = vadd.f32 %v1061_v53, %v2360_v18 }
 0x14f   : > { %v950_v55 = vpop.f32.mrf.mxu0  ;;  %v1063_v57 = vpop.f32.mrf.mxu1 }
 0x150   : > { %1400 = vst [vmem:[%s2370_s12 + $0x2c0] sm:$0xff] %v949_v52  ;;  %v951_v56 = vadd.f32 %v950_v55, %v2363_v19  ;;  %1402 = vst [vmem:[%s2370_s12 + $0x2d0] sm:$0xff] %v1062_v54  ;;  %v1064_v58 = vadd.f32 %v1063_v57, %v2366_v21 }
 0x151   : > { %v954_v59 = vpop.f32.mrf.mxu0  ;;  %v1067_v61 = vpop.f32.mrf.mxu1 }
 0x152   : > { %1401 = vst [vmem:[%s2370_s12 + $0x2c8] sm:$0xff] %v951_v56  ;;  %v955_v60 = vadd.f32 %v954_v59, %v2357_v17  ;;  %1403 = vst [vmem:[%s2370_s12 + $0x2d8] sm:$0xff] %v1064_v58  ;;  %v1068_v62 = vadd.f32 %v1067_v61, %v2360_v18 }
 0x153   : > { %v956_v63 = vpop.f32.mrf.mxu0  ;;  %v1069_v2 = vpop.f32.mrf.mxu1 }
 0x154   : > { %1408 = vst [vmem:[%s2370_s12 + $0x300] sm:$0xff] %v955_v60  ;;  %v957_v1 = vadd.f32 %v956_v63, %v2363_v19  ;;  %1410 = vst [vmem:[%s2370_s12 + $0x310] sm:$0xff] %v1068_v62  ;;  %v1070_v3 = vadd.f32 %v1069_v2, %v2366_v21 }
 0x155   : > { %v958_v4 = vpop.f32.mrf.mxu0  ;;  %v1071_v6 = vpop.f32.mrf.mxu1 }
 0x156   : > { %1409 = vst [vmem:[%s2370_s12 + $0x308] sm:$0xff] %v957_v1  ;;  %v959_v5 = vadd.f32 %v958_v4, %v2357_v17  ;;  %1411 = vst [vmem:[%s2370_s12 + $0x318] sm:$0xff] %v1070_v3  ;;  %v1072_v7 = vadd.f32 %v1071_v6, %v2360_v18 }
 0x157   : > { %v960_v9 = vpop.f32.mrf.mxu0  ;;  %v1073_v11 = vpop.f32.mrf.mxu1 }
 0x158   : > { %1416 = vst [vmem:[%s2370_s12 + $0x340] sm:$0xff] %v959_v5  ;;  %v961_v10 = vadd.f32 %v960_v9, %v2363_v19  ;;  %1418 = vst [vmem:[%s2370_s12 + $0x350] sm:$0xff] %v1072_v7  ;;  %v1074_v8 = vadd.f32 %v1073_v11, %v2366_v21 }
 0x159   : > { %v964_v13 = vpop.f32.mrf.mxu0  ;;  %v1077_v0 = vpop.f32.mrf.mxu1 }
 0x15a   : > { %1417 = vst [vmem:[%s2370_s12 + $0x348] sm:$0xff] %v961_v10  ;;  %v965_v15 = vadd.f32 %v964_v13, %v2357_v17  ;;  %1419 = vst [vmem:[%s2370_s12 + $0x358] sm:$0xff] %v1074_v8  ;;  %v1078_v20 = vadd.f32 %v1077_v0, %v2360_v18 }
 0x15b   : > { %v966_v22 = vpop.f32.mrf.mxu0  ;;  %v1079_v25 = vpop.f32.mrf.mxu1 }
 0x15c   : > { %1424 = vst [vmem:[%s2370_s12 + $0x380] sm:$0xff] %v965_v15  ;;  %v967_v24 = vadd.f32 %v966_v22, %v2363_v19  ;;  %1426 = vst [vmem:[%s2370_s12 + $0x390] sm:$0xff] %v1078_v20  ;;  %v1080_v27 = vadd.f32 %v1079_v25, %v2366_v21 }
 0x15d   : > { %v968_v28 = vpop.f32.mrf.mxu0  ;;  %v1081_v31 = vpop.f32.mrf.mxu1 }
 0x15e   : > { %1425 = vst [vmem:[%s2370_s12 + $0x388] sm:$0xff] %v967_v24  ;;  %v969_v30 = vadd.f32 %v968_v28, %v2357_v17  ;;  %1427 = vst [vmem:[%s2370_s12 + $0x398] sm:$0xff] %v1080_v27  ;;  %v1082_v33 = vadd.f32 %v1081_v31, %v2360_v18  ;;  %v2505_v17 = vrot.slane %v2349_v14, %v474_v26 }
 0x15f   : > { %v970_v34 = vpop.f32.mrf.mxu0  ;;  %v1083_v36 = vpop.f32.mrf.mxu1  ;;  %v2510_v18 = vrot.slane %v2349_v14, %v482_v29 }
 0x160   : > { %1432 = vst [vmem:[%s2370_s12 + $0x3c0] sm:$0xff] %v969_v30  ;;  %v971_v12 = vadd.f32 %v970_v34, %v2363_v19  ;;  %1434 = vst [vmem:[%s2370_s12 + $0x3d0] sm:$0xff] %v1082_v33  ;;  %v1084_v37 = vadd.f32 %v1083_v36, %v2366_v21 }
 0x161   : > { %v1120_v38 = vpop.f32.mrf.mxu0  ;;  %v1233_v40 = vpop.f32.mrf.mxu1 }
 0x162   : > { %1433 = vst [vmem:[%s2370_s12 + $0x3c8] sm:$0xff] %v971_v12  ;;  %v1121_v39 = vadd.f32 %v1120_v38, %v2495_v32  ;;  %1435 = vst [vmem:[%s2370_s12 + $0x3d8] sm:$0xff] %v1084_v37  ;;  %v1234_v19 = vadd.f32 %v1233_v40, %v2500_v35 }
 0x163   : > { %v1122_v41 = vpop.f32.mrf.mxu0  ;;  %v1235_v43 = vpop.f32.mrf.mxu1 }
 0x164   : > { %1316 = vst [vmem:[%s2370_s12 + $0x20] sm:$0xff] %v1121_v39  ;;  %v1123_v42 = vadd.f32 %v1122_v41, %v2505_v17  ;;  %1318 = vst [vmem:[%s2370_s12 + $0x30] sm:$0xff] %v1234_v19  ;;  %v1236_v14 = vadd.f32 %v1235_v43, %v2510_v18 }
 0x165   : > { %v1124_v21 = vpop.f32.mrf.mxu0  ;;  %v1237_v45 = vpop.f32.mrf.mxu1 }
 0x166   : > { %1317 = vst [vmem:[%s2370_s12 + $0x28] sm:$0xff] %v1123_v42  ;;  %v1125_v44 = vadd.f32 %v1124_v21, %v2495_v32  ;;  %1319 = vst [vmem:[%s2370_s12 + $0x38] sm:$0xff] %v1236_v14  ;;  %v1238_v46 = vadd.f32 %v1237_v45, %v2500_v35 }
 0x167   : > { %v1126_v47 = vpop.f32.mrf.mxu0  ;;  %v1239_v49 = vpop.f32.mrf.mxu1 }
 0x168   : > { %1324 = vst [vmem:[%s2370_s12 + $0x60] sm:$0xff] %v1125_v44  ;;  %v1127_v48 = vadd.f32 %v1126_v47, %v2505_v17  ;;  %1326 = vst [vmem:[%s2370_s12 + $0x70] sm:$0xff] %v1238_v46  ;;  %v1240_v50 = vadd.f32 %v1239_v49, %v2510_v18 }
 0x169   : > { %v1130_v51 = vpop.f32.mrf.mxu0  ;;  %v1243_v53 = vpop.f32.mrf.mxu1 }
 0x16a   : > { %1325 = vst [vmem:[%s2370_s12 + $0x68] sm:$0xff] %v1127_v48  ;;  %v1131_v52 = vadd.f32 %v1130_v51, %v2495_v32  ;;  %1327 = vst [vmem:[%s2370_s12 + $0x78] sm:$0xff] %v1240_v50  ;;  %v1244_v54 = vadd.f32 %v1243_v53, %v2500_v35 }
 0x16b   : > { %v1132_v55 = vpop.f32.mrf.mxu0  ;;  %v1245_v57 = vpop.f32.mrf.mxu1 }
 0x16c   : > { %1332 = vst [vmem:[%s2370_s12 + $0xa0] sm:$0xff] %v1131_v52  ;;  %v1133_v56 = vadd.f32 %v1132_v55, %v2505_v17  ;;  %1334 = vst [vmem:[%s2370_s12 + $0xb0] sm:$0xff] %v1244_v54  ;;  %v1246_v58 = vadd.f32 %v1245_v57, %v2510_v18 }
 0x16d   : > { %v1134_v59 = vpop.f32.mrf.mxu0  ;;  %v1247_v61 = vpop.f32.mrf.mxu1 }
 0x16e   : > { %1333 = vst [vmem:[%s2370_s12 + $0xa8] sm:$0xff] %v1133_v56  ;;  %v1135_v60 = vadd.f32 %v1134_v59, %v2495_v32  ;;  %1335 = vst [vmem:[%s2370_s12 + $0xb8] sm:$0xff] %v1246_v58  ;;  %v1248_v62 = vadd.f32 %v1247_v61, %v2500_v35 }
 0x16f   : > { %v1136_v63 = vpop.f32.mrf.mxu0  ;;  %v1249_v2 = vpop.f32.mrf.mxu1 }
 0x170   : > { %1340 = vst [vmem:[%s2370_s12 + $0xe0] sm:$0xff] %v1135_v60  ;;  %v1137_v1 = vadd.f32 %v1136_v63, %v2505_v17  ;;  %1342 = vst [vmem:[%s2370_s12 + $0xf0] sm:$0xff] %v1248_v62  ;;  %v1250_v3 = vadd.f32 %v1249_v2, %v2510_v18 }
 0x171   : > { %v1140_v4 = vpop.f32.mrf.mxu0  ;;  %v1253_v6 = vpop.f32.mrf.mxu1 }
 0x172   : > { %1341 = vst [vmem:[%s2370_s12 + $0xe8] sm:$0xff] %v1137_v1  ;;  %v1141_v5 = vadd.f32 %v1140_v4, %v2495_v32  ;;  %1343 = vst [vmem:[%s2370_s12 + $0xf8] sm:$0xff] %v1250_v3  ;;  %v1254_v7 = vadd.f32 %v1253_v6, %v2500_v35 }
 0x173   : > { %v1142_v9 = vpop.f32.mrf.mxu0  ;;  %v1255_v11 = vpop.f32.mrf.mxu1 }
 0x174   : > { %1348 = vst [vmem:[%s2370_s12 + $0x120] sm:$0xff] %v1141_v5  ;;  %v1143_v10 = vadd.f32 %v1142_v9, %v2505_v17  ;;  %1350 = vst [vmem:[%s2370_s12 + $0x130] sm:$0xff] %v1254_v7  ;;  %v1256_v8 = vadd.f32 %v1255_v11, %v2510_v18 }
 0x175   : > { %v1144_v13 = vpop.f32.mrf.mxu0  ;;  %v1257_v0 = vpop.f32.mrf.mxu1 }
 0x176   : > { %1349 = vst [vmem:[%s2370_s12 + $0x128] sm:$0xff] %v1143_v10  ;;  %v1145_v15 = vadd.f32 %v1144_v13, %v2495_v32  ;;  %1351 = vst [vmem:[%s2370_s12 + $0x138] sm:$0xff] %v1256_v8  ;;  %v1258_v16 = vadd.f32 %v1257_v0, %v2500_v35 }
 0x177   : > { %v1146_v20 = vpop.f32.mrf.mxu0  ;;  %v1259_v23 = vpop.f32.mrf.mxu1 }
 0x178   : > { %1356 = vst [vmem:[%s2370_s12 + $0x160] sm:$0xff] %v1145_v15  ;;  %v1147_v22 = vadd.f32 %v1146_v20, %v2505_v17  ;;  %1358 = vst [vmem:[%s2370_s12 + $0x170] sm:$0xff] %v1258_v16  ;;  %v1260_v24 = vadd.f32 %v1259_v23, %v2510_v18 }
 0x179   : > { %v1150_v25 = vpop.f32.mrf.mxu0  ;;  %v1263_v27 = vpop.f32.mrf.mxu1 }
 0x17a   : > { %1357 = vst [vmem:[%s2370_s12 + $0x168] sm:$0xff] %v1147_v22  ;;  %v1151_v26 = vadd.f32 %v1150_v25, %v2495_v32  ;;  %1359 = vst [vmem:[%s2370_s12 + $0x178] sm:$0xff] %v1260_v24  ;;  %v1264_v28 = vadd.f32 %v1263_v27, %v2500_v35 }
 0x17b   : > { %v1152_v29 = vpop.f32.mrf.mxu0  ;;  %v1265_v31 = vpop.f32.mrf.mxu1 }
 0x17c   : > { %1364 = vst [vmem:[%s2370_s12 + $0x1a0] sm:$0xff] %v1151_v26  ;;  %v1153_v30 = vadd.f32 %v1152_v29, %v2505_v17  ;;  %1366 = vst [vmem:[%s2370_s12 + $0x1b0] sm:$0xff] %v1264_v28  ;;  %v1266_v33 = vadd.f32 %v1265_v31, %v2510_v18 }
 0x17d   : > { %v1154_v34 = vpop.f32.mrf.mxu0  ;;  %v1267_v36 = vpop.f32.mrf.mxu1 }
 0x17e   : > { %1365 = vst [vmem:[%s2370_s12 + $0x1a8] sm:$0xff] %v1153_v30  ;;  %v1155_v12 = vadd.f32 %v1154_v34, %v2495_v32  ;;  %1367 = vst [vmem:[%s2370_s12 + $0x1b8] sm:$0xff] %v1266_v33  ;;  %v1268_v37 = vadd.f32 %v1267_v36, %v2500_v35 }
 0x17f   : > { %v1156_v38 = vpop.f32.mrf.mxu0  ;;  %v1269_v40 = vpop.f32.mrf.mxu1 }
 0x180   : > { %1372 = vst [vmem:[%s2370_s12 + $0x1e0] sm:$0xff] %v1155_v12  ;;  %v1157_v39 = vadd.f32 %v1156_v38, %v2505_v17  ;;  %1374 = vst [vmem:[%s2370_s12 + $0x1f0] sm:$0xff] %v1268_v37  ;;  %v1270_v19 = vadd.f32 %v1269_v40, %v2510_v18 }
 0x181   : > { %v1160_v41 = vpop.f32.mrf.mxu0  ;;  %v1273_v43 = vpop.f32.mrf.mxu1 }
 0x182   : > { %1373 = vst [vmem:[%s2370_s12 + $0x1e8] sm:$0xff] %v1157_v39  ;;  %v1161_v42 = vadd.f32 %v1160_v41, %v2495_v32  ;;  %1375 = vst [vmem:[%s2370_s12 + $0x1f8] sm:$0xff] %v1270_v19  ;;  %v1274_v14 = vadd.f32 %v1273_v43, %v2500_v35 }
 0x183   : > { %v1162_v21 = vpop.f32.mrf.mxu0  ;;  %v1275_v45 = vpop.f32.mrf.mxu1 }
 0x184   : > { %1380 = vst [vmem:[%s2370_s12 + $0x220] sm:$0xff] %v1161_v42  ;;  %v1163_v44 = vadd.f32 %v1162_v21, %v2505_v17  ;;  %1382 = vst [vmem:[%s2370_s12 + $0x230] sm:$0xff] %v1274_v14  ;;  %v1276_v46 = vadd.f32 %v1275_v45, %v2510_v18  ;;  %v1473_v21 = vld [vmem:[%s2370_s12 + $0x20] sm:$0xff] (%p2052_p6)  ;;  %v1477_v45 = vld [vmem:[%s2370_s12 + $0x30] sm:$0xff] (%p2052_p6) }
 0x185   : > { %v1164_v47 = vpop.f32.mrf.mxu0  ;;  %v1277_v49 = vpop.f32.mrf.mxu1  ;;  %1474 = vst [vmem:[%s2651_s11 + $0x20] sm:$0xff] (%p2052_p6), %v1473_v21  ;;  %1478 = vst [vmem:[%s2651_s11 + $0x30] sm:$0xff] (%p2052_p6), %v1477_v45 }
 0x186   : > { %1381 = vst [vmem:[%s2370_s12 + $0x228] sm:$0xff] %v1163_v44  ;;  %v1165_v48 = vadd.f32 %v1164_v47, %v2495_v32  ;;  %1383 = vst [vmem:[%s2370_s12 + $0x238] sm:$0xff] %v1276_v46  ;;  %v1278_v50 = vadd.f32 %v1277_v49, %v2500_v35  ;;  %v1475_v44 = vld [vmem:[%s2370_s12 + $0x28] sm:$0xff] (%p2052_p6)  ;;  %v1479_v46 = vld [vmem:[%s2370_s12 + $0x38] sm:$0xff] (%p2052_p6) }
 0x187   : > { %v1166_v51 = vpop.f32.mrf.mxu0  ;;  %v1279_v53 = vpop.f32.mrf.mxu1  ;;  %1476 = vst [vmem:[%s2651_s11 + $0x28] sm:$0xff] (%p2052_p6), %v1475_v44  ;;  %v1481_v47 = vld [vmem:[%s2370_s12 + $0x40] sm:$0xff] (%p2052_p6)  ;;  %1480 = vst [vmem:[%s2651_s11 + $0x38] sm:$0xff] (%p2052_p6), %v1479_v46  ;;  %v1485_v49 = vld [vmem:[%s2370_s12 + $0x50] sm:$0xff] (%p2052_p6) }
 0x188   : > { %1388 = vst [vmem:[%s2370_s12 + $0x260] sm:$0xff] %v1165_v48  ;;  %v1167_v52 = vadd.f32 %v1166_v51, %v2505_v17  ;;  %1390 = vst [vmem:[%s2370_s12 + $0x270] sm:$0xff] %v1278_v50  ;;  %v1280_v54 = vadd.f32 %v1279_v53, %v2510_v18  ;;  %v1483_v48 = vld [vmem:[%s2370_s12 + $0x48] sm:$0xff] (%p2052_p6)  ;;  %v1487_v50 = vld [vmem:[%s2370_s12 + $0x58] sm:$0xff] (%p2052_p6) }
 0x189   : > { %v1170_v55 = vpop.f32.mrf.mxu0  ;;  %v1283_v57 = vpop.f32.mrf.mxu1  ;;  %1482 = vst [vmem:[%s2651_s11 + $0x80] sm:$0xff] (%p2052_p6), %v1481_v47  ;;  %1484 = vst [vmem:[%s2651_s11 + $0x88] sm:$0xff] (%p2052_p6), %v1483_v48  ;;  %v1489_v51 = vld [vmem:[%s2370_s12 + $0x60] sm:$0xff] (%p2052_p6)  ;;  %v1493_v53 = vld [vmem:[%s2370_s12 + $0x70] sm:$0xff] (%p2052_p6) }
 0x18a   : > { %1389 = vst [vmem:[%s2370_s12 + $0x268] sm:$0xff] %v1167_v52  ;;  %v1171_v56 = vadd.f32 %v1170_v55, %v2495_v32  ;;  %1391 = vst [vmem:[%s2370_s12 + $0x278] sm:$0xff] %v1280_v54  ;;  %v1284_v58 = vadd.f32 %v1283_v57, %v2500_v35  ;;  %v1491_v52 = vld [vmem:[%s2370_s12 + $0x68] sm:$0xff] (%p2052_p6)  ;;  %v1495_v54 = vld [vmem:[%s2370_s12 + $0x78] sm:$0xff] (%p2052_p6) }
 0x18b   : > { %v1172_v59 = vpop.f32.mrf.mxu0  ;;  %v1285_v61 = vpop.f32.mrf.mxu1  ;;  %1486 = vst [vmem:[%s2651_s11 + $0x90] sm:$0xff] (%p2052_p6), %v1485_v49  ;;  %1488 = vst [vmem:[%s2651_s11 + $0x98] sm:$0xff] (%p2052_p6), %v1487_v50  ;;  %v1497_v55 = vld [vmem:[%s2370_s12 + $0x80] sm:$0xff] (%p2052_p6)  ;;  %v1501_v57 = vld [vmem:[%s2370_s12 + $0x90] sm:$0xff] (%p2052_p6) }
 0x18c   : > { %1396 = vst [vmem:[%s2370_s12 + $0x2a0] sm:$0xff] %v1171_v56  ;;  %v1173_v60 = vadd.f32 %v1172_v59, %v2505_v17  ;;  %1398 = vst [vmem:[%s2370_s12 + $0x2b0] sm:$0xff] %v1284_v58  ;;  %v1286_v62 = vadd.f32 %v1285_v61, %v2510_v18  ;;  %v1499_v56 = vld [vmem:[%s2370_s12 + $0x88] sm:$0xff] (%p2052_p6)  ;;  %v1503_v58 = vld [vmem:[%s2370_s12 + $0x98] sm:$0xff] (%p2052_p6) }
 0x18d   : > { %v1174_v63 = vpop.f32.mrf.mxu0  ;;  %v1287_v2 = vpop.f32.mrf.mxu1  ;;  %1490 = vst [vmem:[%s2651_s11 + $0xa0] sm:$0xff] (%p2052_p6), %v1489_v51  ;;  %1492 = vst [vmem:[%s2651_s11 + $0xa8] sm:$0xff] (%p2052_p6), %v1491_v52  ;;  %v1505_v59 = vld [vmem:[%s2370_s12 + $0xa0] sm:$0xff] (%p2052_p6)  ;;  %v1509_v61 = vld [vmem:[%s2370_s12 + $0xb0] sm:$0xff] (%p2052_p6) }
 0x18e   : > { %1397 = vst [vmem:[%s2370_s12 + $0x2a8] sm:$0xff] %v1173_v60  ;;  %v1175_v1 = vadd.f32 %v1174_v63, %v2495_v32  ;;  %1399 = vst [vmem:[%s2370_s12 + $0x2b8] sm:$0xff] %v1286_v62  ;;  %v1288_v3 = vadd.f32 %v1287_v2, %v2500_v35  ;;  %v1507_v60 = vld [vmem:[%s2370_s12 + $0xa8] sm:$0xff] (%p2052_p6)  ;;  %v1511_v62 = vld [vmem:[%s2370_s12 + $0xb8] sm:$0xff] (%p2052_p6) }
 0x18f   : > { %v1176_v4 = vpop.f32.mrf.mxu0  ;;  %v1289_v6 = vpop.f32.mrf.mxu1  ;;  %1494 = vst [vmem:[%s2651_s11 + $0xb0] sm:$0xff] (%p2052_p6), %v1493_v53  ;;  %1496 = vst [vmem:[%s2651_s11 + $0xb8] sm:$0xff] (%p2052_p6), %v1495_v54  ;;  %v1513_v63 = vld [vmem:[%s2370_s12 + $0xc0] sm:$0xff] (%p2052_p6)  ;;  %v1517_v2 = vld [vmem:[%s2370_s12 + $0xd0] sm:$0xff] (%p2052_p6) }
 0x190   : > { %1404 = vst [vmem:[%s2370_s12 + $0x2e0] sm:$0xff] %v1175_v1  ;;  %v1177_v5 = vadd.f32 %v1176_v4, %v2505_v17  ;;  %1406 = vst [vmem:[%s2370_s12 + $0x2f0] sm:$0xff] %v1288_v3  ;;  %v1290_v7 = vadd.f32 %v1289_v6, %v2510_v18  ;;  %v1515_v1 = vld [vmem:[%s2370_s12 + $0xc8] sm:$0xff] (%p2052_p6)  ;;  %v1519_v3 = vld [vmem:[%s2370_s12 + $0xd8] sm:$0xff] (%p2052_p6) }
 0x191   : > { %v1180_v9 = vpop.f32.mrf.mxu0  ;;  %v1293_v11 = vpop.f32.mrf.mxu1  ;;  %1498 = vst [vmem:[%s2651_s11 + $0x100] sm:$0xff] (%p2052_p6), %v1497_v55  ;;  %1500 = vst [vmem:[%s2651_s11 + $0x108] sm:$0xff] (%p2052_p6), %v1499_v56  ;;  %v1521_v4 = vld [vmem:[%s2370_s12 + $0xe0] sm:$0xff] (%p2052_p6)  ;;  %v1525_v6 = vld [vmem:[%s2370_s12 + $0xf0] sm:$0xff] (%p2052_p6) }
 0x192   : > { %1405 = vst [vmem:[%s2370_s12 + $0x2e8] sm:$0xff] %v1177_v5  ;;  %v1181_v10 = vadd.f32 %v1180_v9, %v2495_v32  ;;  %1407 = vst [vmem:[%s2370_s12 + $0x2f8] sm:$0xff] %v1290_v7  ;;  %v1294_v8 = vadd.f32 %v1293_v11, %v2500_v35  ;;  %v1523_v5 = vld [vmem:[%s2370_s12 + $0xe8] sm:$0xff] (%p2052_p6)  ;;  %v1527_v7 = vld [vmem:[%s2370_s12 + $0xf8] sm:$0xff] (%p2052_p6) }
 0x193   : > { %v1182_v13 = vpop.f32.mrf.mxu0  ;;  %v1295_v0 = vpop.f32.mrf.mxu1  ;;  %1502 = vst [vmem:[%s2651_s11 + $0x110] sm:$0xff] (%p2052_p6), %v1501_v57  ;;  %1504 = vst [vmem:[%s2651_s11 + $0x118] sm:$0xff] (%p2052_p6), %v1503_v58  ;;  %v1529_v9 = vld [vmem:[%s2370_s12 + $0x100] sm:$0xff] (%p2052_p6)  ;;  %v1533_v11 = vld [vmem:[%s2370_s12 + $0x110] sm:$0xff] (%p2052_p6) }
 0x194   : > { %1412 = vst [vmem:[%s2370_s12 + $0x320] sm:$0xff] %v1181_v10  ;;  %v1183_v15 = vadd.f32 %v1182_v13, %v2505_v17  ;;  %1414 = vst [vmem:[%s2370_s12 + $0x330] sm:$0xff] %v1294_v8  ;;  %v1296_v16 = vadd.f32 %v1295_v0, %v2510_v18  ;;  %v1531_v10 = vld [vmem:[%s2370_s12 + $0x108] sm:$0xff] (%p2052_p6)  ;;  %v1535_v8 = vld [vmem:[%s2370_s12 + $0x118] sm:$0xff] (%p2052_p6) }
 0x195   : > { %v1184_v20 = vpop.f32.mrf.mxu0  ;;  %v1297_v23 = vpop.f32.mrf.mxu1  ;;  %1506 = vst [vmem:[%s2651_s11 + $0x120] sm:$0xff] (%p2052_p6), %v1505_v59  ;;  %1508 = vst [vmem:[%s2651_s11 + $0x128] sm:$0xff] (%p2052_p6), %v1507_v60  ;;  %v1537_v13 = vld [vmem:[%s2370_s12 + $0x120] sm:$0xff] (%p2052_p6)  ;;  %v1541_v0 = vld [vmem:[%s2370_s12 + $0x130] sm:$0xff] (%p2052_p6) }
 0x196   : > { %1413 = vst [vmem:[%s2370_s12 + $0x328] sm:$0xff] %v1183_v15  ;;  %v1185_v22 = vadd.f32 %v1184_v20, %v2495_v32  ;;  %1415 = vst [vmem:[%s2370_s12 + $0x338] sm:$0xff] %v1296_v16  ;;  %v1298_v24 = vadd.f32 %v1297_v23, %v2500_v35  ;;  %v1539_v15 = vld [vmem:[%s2370_s12 + $0x128] sm:$0xff] (%p2052_p6)  ;;  %v1543_v16 = vld [vmem:[%s2370_s12 + $0x138] sm:$0xff] (%p2052_p6) }
 0x197   : > { %v1186_v25 = vpop.f32.mrf.mxu0  ;;  %v1299_v27 = vpop.f32.mrf.mxu1  ;;  %1510 = vst [vmem:[%s2651_s11 + $0x130] sm:$0xff] (%p2052_p6), %v1509_v61  ;;  %1512 = vst [vmem:[%s2651_s11 + $0x138] sm:$0xff] (%p2052_p6), %v1511_v62  ;;  %v1545_v20 = vld [vmem:[%s2370_s12 + $0x140] sm:$0xff] (%p2052_p6)  ;;  %v1549_v23 = vld [vmem:[%s2370_s12 + $0x150] sm:$0xff] (%p2052_p6) }
 0x198   : > { %1420 = vst [vmem:[%s2370_s12 + $0x360] sm:$0xff] %v1185_v22  ;;  %v1187_v26 = vadd.f32 %v1186_v25, %v2505_v17  ;;  %1422 = vst [vmem:[%s2370_s12 + $0x370] sm:$0xff] %v1298_v24  ;;  %v1300_v28 = vadd.f32 %v1299_v27, %v2510_v18  ;;  %v1547_v22 = vld [vmem:[%s2370_s12 + $0x148] sm:$0xff] (%p2052_p6)  ;;  %v1551_v24 = vld [vmem:[%s2370_s12 + $0x158] sm:$0xff] (%p2052_p6) }
 0x199   : > { %v1190_v29 = vpop.f32.mrf.mxu0  ;;  %v1303_v31 = vpop.f32.mrf.mxu1  ;;  %1514 = vst [vmem:[%s2651_s11 + $0x180] sm:$0xff] (%p2052_p6), %v1513_v63  ;;  %1516 = vst [vmem:[%s2651_s11 + $0x188] sm:$0xff] (%p2052_p6), %v1515_v1  ;;  %v1553_v25 = vld [vmem:[%s2370_s12 + $0x160] sm:$0xff] (%p2052_p6)  ;;  %v1557_v27 = vld [vmem:[%s2370_s12 + $0x170] sm:$0xff] (%p2052_p6) }
 0x19a   : > { %1421 = vst [vmem:[%s2370_s12 + $0x368] sm:$0xff] %v1187_v26  ;;  %v1191_v30 = vadd.f32 %v1190_v29, %v2495_v32  ;;  %1423 = vst [vmem:[%s2370_s12 + $0x378] sm:$0xff] %v1300_v28  ;;  %v1304_v33 = vadd.f32 %v1303_v31, %v2500_v35  ;;  %v1555_v26 = vld [vmem:[%s2370_s12 + $0x168] sm:$0xff] (%p2052_p6)  ;;  %v1559_v28 = vld [vmem:[%s2370_s12 + $0x178] sm:$0xff] (%p2052_p6) }
 0x19b   : > { %v1192_v34 = vpop.f32.mrf.mxu0  ;;  %v1305_v36 = vpop.f32.mrf.mxu1  ;;  %1518 = vst [vmem:[%s2651_s11 + $0x190] sm:$0xff] (%p2052_p6), %v1517_v2  ;;  %1520 = vst [vmem:[%s2651_s11 + $0x198] sm:$0xff] (%p2052_p6), %v1519_v3  ;;  %v1561_v29 = vld [vmem:[%s2370_s12 + $0x180] sm:$0xff] (%p2052_p6)  ;;  %v1565_v31 = vld [vmem:[%s2370_s12 + $0x190] sm:$0xff] (%p2052_p6) }
 0x19c   : > { %1428 = vst [vmem:[%s2370_s12 + $0x3a0] sm:$0xff] %v1191_v30  ;;  %v1193_v12 = vadd.f32 %v1192_v34, %v2505_v17  ;;  %1430 = vst [vmem:[%s2370_s12 + $0x3b0] sm:$0xff] %v1304_v33  ;;  %v1306_v37 = vadd.f32 %v1305_v36, %v2510_v18  ;;  %v1563_v30 = vld [vmem:[%s2370_s12 + $0x188] sm:$0xff] (%p2052_p6)  ;;  %v1567_v33 = vld [vmem:[%s2370_s12 + $0x198] sm:$0xff] (%p2052_p6) }
 0x19d   : > { %v1194_v38 = vpop.f32.mrf.mxu0  ;;  %v1307_v40 = vpop.f32.mrf.mxu1  ;;  %1522 = vst [vmem:[%s2651_s11 + $0x1a0] sm:$0xff] (%p2052_p6), %v1521_v4  ;;  %1524 = vst [vmem:[%s2651_s11 + $0x1a8] sm:$0xff] (%p2052_p6), %v1523_v5  ;;  %v1569_v34 = vld [vmem:[%s2370_s12 + $0x1a0] sm:$0xff] (%p2052_p6)  ;;  %v1573_v36 = vld [vmem:[%s2370_s12 + $0x1b0] sm:$0xff] (%p2052_p6) }
 0x19e   : > { %1429 = vst [vmem:[%s2370_s12 + $0x3a8] sm:$0xff] %v1193_v12  ;;  %v1195_v39 = vadd.f32 %v1194_v38, %v2495_v32  ;;  %1431 = vst [vmem:[%s2370_s12 + $0x3b8] sm:$0xff] %v1306_v37  ;;  %v1308_v19 = vadd.f32 %v1307_v40, %v2500_v35  ;;  %1446 = sbr.rel (!%p2052_p6) target bundleno = 468 (0x1d4), region = 59  ;;  %v1465_v32 = vld [vmem:[%s2370_s12] sm:$0xff] (%p2052_p6)  ;;  %v1467_v35 = vld [vmem:[%s2370_s12 + $0x8] sm:$0xff] (%p2052_p6) }
 0x19f   : > { %v1196_v41 = vpop.f32.mrf.mxu0  ;;  %v1309_v43 = vpop.f32.mrf.mxu1  ;;  %1466 = vst [vmem:[%s2651_s11] sm:$0xff] (%p2052_p6), %v1465_v32  ;;  %1468 = vst [vmem:[%s2651_s11 + $0x8] sm:$0xff] (%p2052_p6), %v1467_v35  ;;  %v1571_v12 = vld [vmem:[%s2370_s12 + $0x1a8] sm:$0xff] (%p2052_p6)  ;;  %v1575_v37 = vld [vmem:[%s2370_s12 + $0x1b8] sm:$0xff] (%p2052_p6) }
 0x1a0   : > { %1436 = vst [vmem:[%s2370_s12 + $0x3e0] sm:$0xff] %v1195_v39  ;;  %v1197_v42 = vadd.f32 %v1196_v41, %v2505_v17  ;;  %1438 = vst [vmem:[%s2370_s12 + $0x3f0] sm:$0xff] %v1308_v19  ;;  %v1310_v14 = vadd.f32 %v1309_v43, %v2510_v18  ;;  %v1469_v17 = vld [vmem:[%s2370_s12 + $0x10] sm:$0xff] (%p2052_p6)  ;;  %v1471_v18 = vld [vmem:[%s2370_s12 + $0x18] sm:$0xff] (%p2052_p6) }
 0x1a1   : > { %1470 = vst [vmem:[%s2651_s11 + $0x10] sm:$0xff] (%p2052_p6), %v1469_v17  ;;  %1472 = vst [vmem:[%s2651_s11 + $0x18] sm:$0xff] (%p2052_p6), %v1471_v18  ;;  %v1577_v38 = vld [vmem:[%s2370_s12 + $0x1c0] sm:$0xff] (%p2052_p6)  ;;  %v1579_v39 = vld [vmem:[%s2370_s12 + $0x1c8] sm:$0xff] (%p2052_p6) }
 0x1a2   : > { %1437 = vst [vmem:[%s2370_s12 + $0x3e8] sm:$0xff] %v1197_v42  ;;  %1439 = vst [vmem:[%s2370_s12 + $0x3f8] sm:$0xff] %v1310_v14  ;;  %v1581_v40 = vld [vmem:[%s2370_s12 + $0x1d0] sm:$0xff] (%p2052_p6)  ;;  %v1583_v19 = vld [vmem:[%s2370_s12 + $0x1d8] sm:$0xff] (%p2052_p6) }
 0x1a3   : > { %1526 = vst [vmem:[%s2651_s11 + $0x1b0] sm:$0xff] %v1525_v6  ;;  %1528 = vst [vmem:[%s2651_s11 + $0x1b8] sm:$0xff] %v1527_v7  ;;  %v1585_v41 = vld [vmem:[%s2370_s12 + $0x1e0] sm:$0xff]  ;;  %v1587_v42 = vld [vmem:[%s2370_s12 + $0x1e8] sm:$0xff] }
 0x1a4   : > { %1530 = vst [vmem:[%s2651_s11 + $0x200] sm:$0xff] %v1529_v9  ;;  %1532 = vst [vmem:[%s2651_s11 + $0x208] sm:$0xff] %v1531_v10  ;;  %v1589_v43 = vld [vmem:[%s2370_s12 + $0x1f0] sm:$0xff]  ;;  %v1591_v14 = vld [vmem:[%s2370_s12 + $0x1f8] sm:$0xff] }
 0x1a5   : > { %1534 = vst [vmem:[%s2651_s11 + $0x210] sm:$0xff] %v1533_v11  ;;  %1536 = vst [vmem:[%s2651_s11 + $0x218] sm:$0xff] %v1535_v8  ;;  %v1593_v32 = vld [vmem:[%s2370_s12 + $0x200] sm:$0xff]  ;;  %v1595_v35 = vld [vmem:[%s2370_s12 + $0x208] sm:$0xff] }
 0x1a6   : > { %1538 = vst [vmem:[%s2651_s11 + $0x220] sm:$0xff] %v1537_v13  ;;  %1540 = vst [vmem:[%s2651_s11 + $0x228] sm:$0xff] %v1539_v15  ;;  %v1597_v17 = vld [vmem:[%s2370_s12 + $0x210] sm:$0xff]  ;;  %v1599_v18 = vld [vmem:[%s2370_s12 + $0x218] sm:$0xff] }
 0x1a7   : > { %1542 = vst [vmem:[%s2651_s11 + $0x230] sm:$0xff] %v1541_v0  ;;  %1544 = vst [vmem:[%s2651_s11 + $0x238] sm:$0xff] %v1543_v16  ;;  %v1601_v21 = vld [vmem:[%s2370_s12 + $0x220] sm:$0xff]  ;;  %v1603_v44 = vld [vmem:[%s2370_s12 + $0x228] sm:$0xff] }
 0x1a8   : > { %1546 = vst [vmem:[%s2651_s11 + $0x280] sm:$0xff] %v1545_v20  ;;  %1548 = vst [vmem:[%s2651_s11 + $0x288] sm:$0xff] %v1547_v22  ;;  %v1605_v45 = vld [vmem:[%s2370_s12 + $0x230] sm:$0xff]  ;;  %v1607_v46 = vld [vmem:[%s2370_s12 + $0x238] sm:$0xff] }
 0x1a9   : > { %1550 = vst [vmem:[%s2651_s11 + $0x290] sm:$0xff] %v1549_v23  ;;  %1552 = vst [vmem:[%s2651_s11 + $0x298] sm:$0xff] %v1551_v24  ;;  %v1609_v47 = vld [vmem:[%s2370_s12 + $0x240] sm:$0xff]  ;;  %v1611_v48 = vld [vmem:[%s2370_s12 + $0x248] sm:$0xff] }
 0x1aa   : > { %1554 = vst [vmem:[%s2651_s11 + $0x2a0] sm:$0xff] %v1553_v25  ;;  %1556 = vst [vmem:[%s2651_s11 + $0x2a8] sm:$0xff] %v1555_v26  ;;  %v1613_v49 = vld [vmem:[%s2370_s12 + $0x250] sm:$0xff]  ;;  %v1615_v50 = vld [vmem:[%s2370_s12 + $0x258] sm:$0xff] }
 0x1ab   : > { %1558 = vst [vmem:[%s2651_s11 + $0x2b0] sm:$0xff] %v1557_v27  ;;  %1560 = vst [vmem:[%s2651_s11 + $0x2b8] sm:$0xff] %v1559_v28  ;;  %v1617_v51 = vld [vmem:[%s2370_s12 + $0x260] sm:$0xff]  ;;  %v1619_v52 = vld [vmem:[%s2370_s12 + $0x268] sm:$0xff] }
 0x1ac   : > { %1562 = vst [vmem:[%s2651_s11 + $0x300] sm:$0xff] %v1561_v29  ;;  %1564 = vst [vmem:[%s2651_s11 + $0x308] sm:$0xff] %v1563_v30  ;;  %v1621_v53 = vld [vmem:[%s2370_s12 + $0x270] sm:$0xff]  ;;  %v1623_v54 = vld [vmem:[%s2370_s12 + $0x278] sm:$0xff] }
 0x1ad   : > { %1566 = vst [vmem:[%s2651_s11 + $0x310] sm:$0xff] %v1565_v31  ;;  %1568 = vst [vmem:[%s2651_s11 + $0x318] sm:$0xff] %v1567_v33  ;;  %v1625_v55 = vld [vmem:[%s2370_s12 + $0x280] sm:$0xff]  ;;  %v1627_v56 = vld [vmem:[%s2370_s12 + $0x288] sm:$0xff] }
 0x1ae   : > { %1570 = vst [vmem:[%s2651_s11 + $0x320] sm:$0xff] %v1569_v34  ;;  %1572 = vst [vmem:[%s2651_s11 + $0x328] sm:$0xff] %v1571_v12  ;;  %v1629_v57 = vld [vmem:[%s2370_s12 + $0x290] sm:$0xff]  ;;  %v1631_v58 = vld [vmem:[%s2370_s12 + $0x298] sm:$0xff] }
 0x1af   : > { %1574 = vst [vmem:[%s2651_s11 + $0x330] sm:$0xff] %v1573_v36  ;;  %1576 = vst [vmem:[%s2651_s11 + $0x338] sm:$0xff] %v1575_v37  ;;  %v1633_v59 = vld [vmem:[%s2370_s12 + $0x2a0] sm:$0xff]  ;;  %v1635_v60 = vld [vmem:[%s2370_s12 + $0x2a8] sm:$0xff] }
 0x1b0   : > { %1578 = vst [vmem:[%s2651_s11 + $0x380] sm:$0xff] %v1577_v38  ;;  %1580 = vst [vmem:[%s2651_s11 + $0x388] sm:$0xff] %v1579_v39  ;;  %v1637_v61 = vld [vmem:[%s2370_s12 + $0x2b0] sm:$0xff]  ;;  %v1639_v62 = vld [vmem:[%s2370_s12 + $0x2b8] sm:$0xff] }
 0x1b1   : > { %1582 = vst [vmem:[%s2651_s11 + $0x390] sm:$0xff] %v1581_v40  ;;  %1584 = vst [vmem:[%s2651_s11 + $0x398] sm:$0xff] %v1583_v19  ;;  %v1641_v63 = vld [vmem:[%s2370_s12 + $0x2c0] sm:$0xff]  ;;  %v1643_v1 = vld [vmem:[%s2370_s12 + $0x2c8] sm:$0xff] }
 0x1b2   : > { %1586 = vst [vmem:[%s2651_s11 + $0x3a0] sm:$0xff] %v1585_v41  ;;  %1588 = vst [vmem:[%s2651_s11 + $0x3a8] sm:$0xff] %v1587_v42  ;;  %v1645_v2 = vld [vmem:[%s2370_s12 + $0x2d0] sm:$0xff]  ;;  %v1647_v3 = vld [vmem:[%s2370_s12 + $0x2d8] sm:$0xff] }
 0x1b3   : > { %1590 = vst [vmem:[%s2651_s11 + $0x3b0] sm:$0xff] %v1589_v43  ;;  %1592 = vst [vmem:[%s2651_s11 + $0x3b8] sm:$0xff] %v1591_v14  ;;  %v1649_v4 = vld [vmem:[%s2370_s12 + $0x2e0] sm:$0xff]  ;;  %v1651_v5 = vld [vmem:[%s2370_s12 + $0x2e8] sm:$0xff] }
 0x1b4   : > { %1594 = vst [vmem:[%s2651_s11 + $0x400] sm:$0xff] %v1593_v32  ;;  %1596 = vst [vmem:[%s2651_s11 + $0x408] sm:$0xff] %v1595_v35  ;;  %v1653_v6 = vld [vmem:[%s2370_s12 + $0x2f0] sm:$0xff]  ;;  %v1655_v7 = vld [vmem:[%s2370_s12 + $0x2f8] sm:$0xff] }
 0x1b5   : > { %1598 = vst [vmem:[%s2651_s11 + $0x410] sm:$0xff] %v1597_v17  ;;  %1600 = vst [vmem:[%s2651_s11 + $0x418] sm:$0xff] %v1599_v18  ;;  %v1657_v9 = vld [vmem:[%s2370_s12 + $0x300] sm:$0xff]  ;;  %v1659_v10 = vld [vmem:[%s2370_s12 + $0x308] sm:$0xff] }
 0x1b6   : > { %1602 = vst [vmem:[%s2651_s11 + $0x420] sm:$0xff] %v1601_v21  ;;  %1604 = vst [vmem:[%s2651_s11 + $0x428] sm:$0xff] %v1603_v44  ;;  %v1661_v11 = vld [vmem:[%s2370_s12 + $0x310] sm:$0xff]  ;;  %v1663_v8 = vld [vmem:[%s2370_s12 + $0x318] sm:$0xff] }
 0x1b7   : > { %1606 = vst [vmem:[%s2651_s11 + $0x430] sm:$0xff] %v1605_v45  ;;  %1608 = vst [vmem:[%s2651_s11 + $0x438] sm:$0xff] %v1607_v46  ;;  %v1665_v13 = vld [vmem:[%s2370_s12 + $0x320] sm:$0xff]  ;;  %v1667_v15 = vld [vmem:[%s2370_s12 + $0x328] sm:$0xff] }
 0x1b8   : > { %1610 = vst [vmem:[%s2651_s11 + $0x480] sm:$0xff] %v1609_v47  ;;  %1612 = vst [vmem:[%s2651_s11 + $0x488] sm:$0xff] %v1611_v48  ;;  %v1669_v0 = vld [vmem:[%s2370_s12 + $0x330] sm:$0xff]  ;;  %v1671_v16 = vld [vmem:[%s2370_s12 + $0x338] sm:$0xff] }
 0x1b9   : > { %1614 = vst [vmem:[%s2651_s11 + $0x490] sm:$0xff] %v1613_v49  ;;  %1616 = vst [vmem:[%s2651_s11 + $0x498] sm:$0xff] %v1615_v50  ;;  %v1673_v20 = vld [vmem:[%s2370_s12 + $0x340] sm:$0xff]  ;;  %v1675_v22 = vld [vmem:[%s2370_s12 + $0x348] sm:$0xff] }
 0x1ba   : > { %1618 = vst [vmem:[%s2651_s11 + $0x4a0] sm:$0xff] %v1617_v51  ;;  %1620 = vst [vmem:[%s2651_s11 + $0x4a8] sm:$0xff] %v1619_v52  ;;  %v1677_v23 = vld [vmem:[%s2370_s12 + $0x350] sm:$0xff]  ;;  %v1679_v24 = vld [vmem:[%s2370_s12 + $0x358] sm:$0xff] }
 0x1bb   : > { %1622 = vst [vmem:[%s2651_s11 + $0x4b0] sm:$0xff] %v1621_v53  ;;  %1624 = vst [vmem:[%s2651_s11 + $0x4b8] sm:$0xff] %v1623_v54  ;;  %v1681_v25 = vld [vmem:[%s2370_s12 + $0x360] sm:$0xff]  ;;  %v1683_v26 = vld [vmem:[%s2370_s12 + $0x368] sm:$0xff] }
 0x1bc   : > { %1626 = vst [vmem:[%s2651_s11 + $0x500] sm:$0xff] %v1625_v55  ;;  %1628 = vst [vmem:[%s2651_s11 + $0x508] sm:$0xff] %v1627_v56  ;;  %v1685_v27 = vld [vmem:[%s2370_s12 + $0x370] sm:$0xff]  ;;  %v1687_v28 = vld [vmem:[%s2370_s12 + $0x378] sm:$0xff] }
 0x1bd   : > { %1630 = vst [vmem:[%s2651_s11 + $0x510] sm:$0xff] %v1629_v57  ;;  %1632 = vst [vmem:[%s2651_s11 + $0x518] sm:$0xff] %v1631_v58  ;;  %v1689_v29 = vld [vmem:[%s2370_s12 + $0x380] sm:$0xff]  ;;  %v1691_v30 = vld [vmem:[%s2370_s12 + $0x388] sm:$0xff] }
 0x1be   : > { %1634 = vst [vmem:[%s2651_s11 + $0x520] sm:$0xff] %v1633_v59  ;;  %1636 = vst [vmem:[%s2651_s11 + $0x528] sm:$0xff] %v1635_v60  ;;  %v1693_v31 = vld [vmem:[%s2370_s12 + $0x390] sm:$0xff]  ;;  %v1695_v33 = vld [vmem:[%s2370_s12 + $0x398] sm:$0xff] }
 0x1bf   : > { %1638 = vst [vmem:[%s2651_s11 + $0x530] sm:$0xff] %v1637_v61  ;;  %1640 = vst [vmem:[%s2651_s11 + $0x538] sm:$0xff] %v1639_v62  ;;  %v1697_v34 = vld [vmem:[%s2370_s12 + $0x3a0] sm:$0xff]  ;;  %v1699_v12 = vld [vmem:[%s2370_s12 + $0x3a8] sm:$0xff] }
 0x1c0   : > { %1642 = vst [vmem:[%s2651_s11 + $0x580] sm:$0xff] %v1641_v63  ;;  %1644 = vst [vmem:[%s2651_s11 + $0x588] sm:$0xff] %v1643_v1  ;;  %v1701_v36 = vld [vmem:[%s2370_s12 + $0x3b0] sm:$0xff]  ;;  %v1703_v37 = vld [vmem:[%s2370_s12 + $0x3b8] sm:$0xff] }
 0x1c1   : > { %1646 = vst [vmem:[%s2651_s11 + $0x590] sm:$0xff] %v1645_v2  ;;  %1648 = vst [vmem:[%s2651_s11 + $0x598] sm:$0xff] %v1647_v3  ;;  %v1705_v38 = vld [vmem:[%s2370_s12 + $0x3c0] sm:$0xff]  ;;  %v1707_v39 = vld [vmem:[%s2370_s12 + $0x3c8] sm:$0xff] }
 0x1c2   : > { %1650 = vst [vmem:[%s2651_s11 + $0x5a0] sm:$0xff] %v1649_v4  ;;  %1652 = vst [vmem:[%s2651_s11 + $0x5a8] sm:$0xff] %v1651_v5  ;;  %v1709_v40 = vld [vmem:[%s2370_s12 + $0x3d0] sm:$0xff]  ;;  %v1711_v19 = vld [vmem:[%s2370_s12 + $0x3d8] sm:$0xff] }
 0x1c3   : > { %1654 = vst [vmem:[%s2651_s11 + $0x5b0] sm:$0xff] %v1653_v6  ;;  %1656 = vst [vmem:[%s2651_s11 + $0x5b8] sm:$0xff] %v1655_v7  ;;  %v1713_v41 = vld [vmem:[%s2370_s12 + $0x3e0] sm:$0xff]  ;;  %v1715_v42 = vld [vmem:[%s2370_s12 + $0x3e8] sm:$0xff] }
 0x1c4   : > { %1658 = vst [vmem:[%s2651_s11 + $0x600] sm:$0xff] %v1657_v9  ;;  %1660 = vst [vmem:[%s2651_s11 + $0x608] sm:$0xff] %v1659_v10  ;;  %v1717_v43 = vld [vmem:[%s2370_s12 + $0x3f0] sm:$0xff]  ;;  %v1719_v14 = vld [vmem:[%s2370_s12 + $0x3f8] sm:$0xff] }
 0x1c5   : > { %1662 = vst [vmem:[%s2651_s11 + $0x610] sm:$0xff] %v1661_v11  ;;  %1664 = vst [vmem:[%s2651_s11 + $0x618] sm:$0xff] %v1663_v8 }
 0x1c6   : > { %1666 = vst [vmem:[%s2651_s11 + $0x620] sm:$0xff] %v1665_v13  ;;  %1668 = vst [vmem:[%s2651_s11 + $0x628] sm:$0xff] %v1667_v15 }
 0x1c7   : > { %1670 = vst [vmem:[%s2651_s11 + $0x630] sm:$0xff] %v1669_v0  ;;  %1672 = vst [vmem:[%s2651_s11 + $0x638] sm:$0xff] %v1671_v16 }
 0x1c8   : > { %1674 = vst [vmem:[%s2651_s11 + $0x680] sm:$0xff] %v1673_v20  ;;  %1676 = vst [vmem:[%s2651_s11 + $0x688] sm:$0xff] %v1675_v22 }
 0x1c9   : > { %1678 = vst [vmem:[%s2651_s11 + $0x690] sm:$0xff] %v1677_v23  ;;  %1680 = vst [vmem:[%s2651_s11 + $0x698] sm:$0xff] %v1679_v24 }
 0x1ca   : > { %1682 = vst [vmem:[%s2651_s11 + $0x6a0] sm:$0xff] %v1681_v25  ;;  %1684 = vst [vmem:[%s2651_s11 + $0x6a8] sm:$0xff] %v1683_v26 }
 0x1cb   : > { %1686 = vst [vmem:[%s2651_s11 + $0x6b0] sm:$0xff] %v1685_v27  ;;  %1688 = vst [vmem:[%s2651_s11 + $0x6b8] sm:$0xff] %v1687_v28 }
 0x1cc   : > { %1690 = vst [vmem:[%s2651_s11 + $0x700] sm:$0xff] %v1689_v29  ;;  %1692 = vst [vmem:[%s2651_s11 + $0x708] sm:$0xff] %v1691_v30 }
 0x1cd   : > { %1694 = vst [vmem:[%s2651_s11 + $0x710] sm:$0xff] %v1693_v31  ;;  %1696 = vst [vmem:[%s2651_s11 + $0x718] sm:$0xff] %v1695_v33 }
 0x1ce   : > { %1698 = vst [vmem:[%s2651_s11 + $0x720] sm:$0xff] %v1697_v34  ;;  %1700 = vst [vmem:[%s2651_s11 + $0x728] sm:$0xff] %v1699_v12 }
 0x1cf   : > { %1702 = vst [vmem:[%s2651_s11 + $0x730] sm:$0xff] %v1701_v36  ;;  %1704 = vst [vmem:[%s2651_s11 + $0x738] sm:$0xff] %v1703_v37 }
 0x1d0   : > { %1706 = vst [vmem:[%s2651_s11 + $0x780] sm:$0xff] %v1705_v38  ;;  %1708 = vst [vmem:[%s2651_s11 + $0x788] sm:$0xff] %v1707_v39 }
 0x1d1   : > { %1710 = vst [vmem:[%s2651_s11 + $0x790] sm:$0xff] %v1709_v40  ;;  %1712 = vst [vmem:[%s2651_s11 + $0x798] sm:$0xff] %v1711_v19 }
 0x1d2   : > { %1714 = vst [vmem:[%s2651_s11 + $0x7a0] sm:$0xff] %v1713_v41  ;;  %1716 = vst [vmem:[%s2651_s11 + $0x7a8] sm:$0xff] %v1715_v42 }
 0x1d3   : > { %1718 = vst [vmem:[%s2651_s11 + $0x7b0] sm:$0xff] %v1717_v43  ;;  %1720 = vst [vmem:[%s2651_s11 + $0x7b8] sm:$0xff] %v1719_v14 }
 0x1d4 PF: > { %s13_s16 = sadd.s32 1, %s1994_s16   ;;  %s2926_s12 = smov %s1982_s13 }
 0x1d5   : > { %p10_p12 = scmp.ge.s32.totalorder %s13_s16, 4   ;;  %s2927_s13 = smov %s2057_s22 }
 0x1d6   : > { %s2928_s14 = smov %s1990_s15  ;;  %s2929_s15 = smov %s2931_s17 }
 0x1d7   :  { %12 = sbr.rel (!%p10_p12) target bundleno = 3 (0x3), region = 119 }

</bundles_post_ra>
